<compile_context>
chip_gen: v6e
topology: v6e:2x2x1
jax: 0.10.0
libtpu: 0.0.40
codegen_flags: <defaults>
</compile_context>

<pallas_src>
import functools

import jax
import jax.numpy as jnp
from jax.experimental import pallas as pl
from jax.experimental.pallas import tpu as pltpu


# --------------------------------------------------------------------------- #
# Kernel body
# --------------------------------------------------------------------------- #
def ffn_kernel(x_ref, wgu_ref, bgu_ref, wd_ref, bd_ref, o_ref, acc_ref, *, tile_f):
    """One (row-tile, F-chunk) step.

      gu   = x @ Wgu_chunk + bgu_chunk        (single fused gate+up matmul)
      gate = gu[:, :tile_f]
      up   = silu(gu[:, tile_f:])             (SiLU applied to up_output, as in the module)
      acc += (gate * up) @ Wd_chunk           (f32 accumulator across F chunks)
    Last F-chunk: out = acc + bd.
    """
    f = pl.program_id(1)

    @pl.when(f == 0)
    def _init():
        acc_ref[...] = jnp.zeros_like(acc_ref)

    # Feed native-dtype operands to the MXU; accumulate in f32.
    x = x_ref[...]
    gu = jnp.dot(x, wgu_ref[...], preferred_element_type=jnp.float32)
    gu = gu + bgu_ref[...].astype(jnp.float32)

    gate = gu[:, :tile_f]
    up = gu[:, tile_f:]
    up = up * jax.nn.sigmoid(up)  # SiLU on the up projection (matches PyTorch forward)

    act = (gate * up).astype(wd_ref.dtype)  # back to weight dtype before the MXU
    acc_ref[...] += jnp.dot(act, wd_ref[...], preferred_element_type=jnp.float32)

    @pl.when(f == pl.num_programs(1) - 1)
    def _finalize():
        o_ref[...] = (acc_ref[...] + bd_ref[...].astype(jnp.float32)).astype(o_ref.dtype)


# --------------------------------------------------------------------------- #
# Tile selection (VMEM-budget aware; safe on v5e/v6e/v7x)
# --------------------------------------------------------------------------- #
def _vmem_estimate(tile_m, H, tile_f, a_item, w_item):
    """Bytes of VMEM used by one pipeline stage set (double-buffered I/O + scratch)."""
    est = 2 * (
        tile_m * H * a_item            # x row tile (in)
        + H * 2 * tile_f * w_item      # fused Wg|Wu chunk
        + 2 * tile_f * w_item          # fused bias chunk
        + tile_f * H * w_item          # Wd chunk
        + H * w_item                   # bd
        + tile_m * H * a_item          # output tile
    )
    est += tile_m * H * 4              # f32 accumulator scratch
    est += tile_m * 2 * tile_f * 4     # in-flight f32 gate/up intermediate
    return est


def _pick_tiles(M, H, F, a_item, w_item, budget=48 << 20):
    """Largest MXU-friendly (tile_m, tile_f) that fits a conservative VMEM budget."""
    m_cap = max(8, ((M + 7) // 8) * 8)
    m_cands = []
    for c in (256, 128, 64, 32, 16, 8):
        tm = min(c, m_cap)
        if tm not in m_cands:
            m_cands.append(tm)
    f_cands = [c for c in (2048, 1024, 512, 256, 128) if F % c == 0] or [F]

    for tm in m_cands:
        for tf in f_cands:
            if _vmem_estimate(tm, H, tf, a_item, w_item) <= budget:
                return tm, tf
    return m_cands[-1], f_cands[-1]


# --------------------------------------------------------------------------- #
# Weight fusion (do once; gate+up columns interleaved per F-chunk)
# --------------------------------------------------------------------------- #
def fuse_gate_up(wg, bg, wu, bu, tile_f):
    H, F = wg.shape
    nf = F // tile_f
    wgu = jnp.concatenate(
        [wg.reshape(H, nf, tile_f), wu.reshape(H, nf, tile_f)], axis=2
    ).reshape(H, 2 * F)
    bgu = jnp.concatenate(
        [bg.reshape(1, nf, tile_f), bu.reshape(1, nf, tile_f)], axis=2
    ).reshape(1, 2 * F)
    return wgu, bgu


# --------------------------------------------------------------------------- #
# Pallas call wrapper
# --------------------------------------------------------------------------- #
@functools.partial(jax.jit, static_argnames=("tile_m", "tile_f"))
def feed_forward_fused(x, wgu, bgu, wd, bd, *, tile_m, tile_f):
    """x: (..., H). wgu: (H, 2F) fused per F-chunk; wd: (F, H); bgu: (1, 2F); bd: (1, H)."""
    orig_shape = x.shape
    H = orig_shape[-1]
    F = wd.shape[0]
    assert F % tile_f == 0
    nf = F // tile_f

    x2 = x.reshape(-1, H)
    M = x2.shape[0]

    # Pad the token axis so any M works.
    n_rows = pl.cdiv(M, tile_m)
    M_pad = n_rows * tile_m
    if M_pad != M:
        x2 = jnp.pad(x2, ((0, M_pad - M), (0, 0)))

    grid = (n_rows, nf)

    a_item = x2.dtype.itemsize
    w_item = wgu.dtype.itemsize
    est = _vmem_estimate(tile_m, H, tile_f, a_item, w_item)
    # Clamp to what fits every generation (v7x has 64 MiB VMEM per TensorCore).
    vmem_limit = int(min(max(est + (8 << 20), 32 << 20), 64 << 20))

    # Advisory cost estimate for XLA's scheduler.
    w_bytes = (wgu.size + bgu.size + wd.size + bd.size) * w_item
    cost = pl.CostEstimate(
        flops=6 * M_pad * H * F,                     # gate+up (4MHF) + down (2MFH)
        transcendentals=M_pad * F,                   # sigmoid per up element
        bytes_accessed=2 * M_pad * H * a_item + n_rows * w_bytes,
    )

    out = pl.pallas_call(
        functools.partial(ffn_kernel, tile_f=tile_f),
        out_shape=jax.ShapeDtypeStruct((M_pad, H), x.dtype),
        grid_spec=pltpu.PrefetchScalarGridSpec(
            num_scalar_prefetch=0,
            grid=grid,
            in_specs=[
                pl.BlockSpec((tile_m, H), lambda i, f: (i, 0)),      # x row tile
                pl.BlockSpec((H, 2 * tile_f), lambda i, f: (0, f)),  # fused Wg|Wu chunk
                pl.BlockSpec((1, 2 * tile_f), lambda i, f: (0, f)),  # fused bg|bu chunk
                pl.BlockSpec((tile_f, H), lambda i, f: (f, 0)),      # Wd chunk
                pl.BlockSpec((1, H), lambda i, f: (0, 0)),           # bd (resident)
            ],
            out_specs=pl.BlockSpec((tile_m, H), lambda i, f: (i, 0)),
            scratch_shapes=[pltpu.VMEM((tile_m, H), jnp.float32)],
        ),
        compiler_params=pltpu.CompilerParams(
            dimension_semantics=("parallel", "arbitrary"),
            vmem_limit_bytes=vmem_limit,
        ),
        cost_estimate=cost,
    )(x2, wgu, bgu, wd, bd)

    if M_pad != M:
        out = out[:M]
    return out.reshape(orig_shape)


def feed_forward(x, wg, bg, wu, bu, wd, bd):
    """Convenience wrapper matching the module signature (unfused weights)."""
    H = x.shape[-1]
    F = wg.shape[1]
    M = 1
    for d in x.shape[:-1]:
        M *= d
    tile_m, tile_f = _pick_tiles(M, H, F, x.dtype.itemsize, wg.dtype.itemsize)
    wgu, bgu = fuse_gate_up(wg, bg, wu, bu, tile_f)
    return feed_forward_fused(x, wgu, bgu, wd, bd, tile_m=tile_m, tile_f=tile_f)


# --------------------------------------------------------------------------- #
# Init + reference
# --------------------------------------------------------------------------- #
def init_params(key, hidden_dimension, output_dimension, dtype=jnp.float32):
    """Deterministic init mimicking nn.Linear's uniform(-1/sqrt(fan_in), +)."""
    kg, kgb, ku, kub, kd, kdb = jax.random.split(key, 6)

    def lin(kw, kb, fan_in, fan_out):
        bound = 1.0 / jnp.sqrt(fan_in)
        w = jax.random.uniform(kw, (fan_in, fan_out), dtype, -bound, bound)  # [in, out]
        b = jax.random.uniform(kb, (1, fan_out), dtype, -bound, bound)
        return w, b

    wg, bg = lin(kg, kgb, hidden_dimension, output_dimension)
    wu, bu = lin(ku, kub, hidden_dimension, output_dimension)
    wd, bd = lin(kd, kdb, output_dimension, hidden_dimension)
    return wg, bg, wu, bu, wd, bd


def reference(x, wg, bg, wu, bu, wd, bd):
    gate = x @ wg + bg
    up = x @ wu + bu
    up = up * jax.nn.sigmoid(up)   # module applies SiLU to up_output, not gate
    return (gate * up) @ wd + bd


if __name__ == "__main__":
    # Small shapes consistent with the module (hidden -> output -> hidden).
    hidden_dimension = 256
    output_dimension = 512
    batch, seq = 2, 8

    key = jax.random.PRNGKey(0)
    k_params, k_x = jax.random.split(key)

    params = init_params(k_params, hidden_dimension, output_dimension)
    x = jax.random.normal(k_x, (batch, seq, hidden_dimension), jnp.float32)

    out = feed_forward(x, *params)
    out = jax.block_until_ready(out)

    ref = reference(x.reshape(-1, hidden_dimension), *params).reshape(x.shape)
    assert out.shape == (batch, seq, hidden_dimension)
    assert jnp.allclose(out, ref, atol=1e-3, rtol=1e-3), "mismatch vs reference"

    print("KERNEL_OK")
</pallas_src>

<mosaic_0001>
module attributes {stable_mosaic.version = 11 : i64} {
  func.func @ffn_kernel(%arg0: i32, %arg1: i32, %arg2: memref<16x256xf32, #tpu.memory_space<vmem>>, %arg3: memref<256x1024xf32, #tpu.memory_space<vmem>>, %arg4: memref<1x1024xf32, #tpu.memory_space<vmem>>, %arg5: memref<512x256xf32, #tpu.memory_space<vmem>>, %arg6: memref<1x256xf32, #tpu.memory_space<vmem>>, %arg7: memref<16x256xf32, #tpu.memory_space<vmem>>, %arg8: memref<16x256xf32, #tpu.memory_space<vmem>>) attributes {dimension_semantics = [#tpu.dimension_semantics<parallel>, #tpu.dimension_semantics<arbitrary>], iteration_bounds = array<i64: 1, 1>, scalar_prefetch = 0 : i64, scratch_operands = 1 : i64, tpu.core_type = #tpu.core_type<tc>, window_params = [{transform_indices = @transform_0, window_bounds = array<i64: 16, 256>}, {transform_indices = @transform_1, window_bounds = array<i64: 256, 1024>}, {transform_indices = @transform_2, window_bounds = array<i64: 1, 1024>}, {transform_indices = @transform_3, window_bounds = array<i64: 512, 256>}, {pipeline_mode = #tpu.pipeline_mode<synchronous>, transform_indices = @transform_4, window_bounds = array<i64: 1, 256>}, {transform_indices = @transform_5, window_bounds = array<i64: 16, 256>}]} {
    %c0_i32 = arith.constant 0 : i32
    %0 = arith.cmpi eq, %arg1, %c0_i32 : i32
    %1 = arith.extui %0 : i1 to i32
    %c0_i32_0 = arith.constant 0 : i32
    %2 = arith.cmpi ne, %1, %c0_i32_0 : i32
    scf.if %2 {
      %cst_16 = arith.constant 0.000000e+00 : f32
      %26 = vector.broadcast %cst_16 : f32 to vector<16x256xf32>
      %c0_17 = arith.constant 0 : index
      %c0_18 = arith.constant 0 : index
      %27 = vector.load %arg8[%c0_17, %c0_18] : memref<16x256xf32, #tpu.memory_space<vmem>>, vector<16x256xf32>
      tpu.vector_store %arg8[%c0_17, %c0_18], %26 {strides = array<i32>} : memref<16x256xf32, #tpu.memory_space<vmem>>, vector<16x256xf32>,
    } else {
    }
    %c0 = arith.constant 0 : index
    %c0_1 = arith.constant 0 : index
    %3 = vector.load %arg2[%c0, %c0_1] : memref<16x256xf32, #tpu.memory_space<vmem>>, vector<16x256xf32>
    %c0_2 = arith.constant 0 : index
    %c0_3 = arith.constant 0 : index
    %4 = vector.load %arg3[%c0_2, %c0_3] : memref<256x1024xf32, #tpu.memory_space<vmem>>, vector<256x1024xf32>
    %cst = arith.constant dense<0.000000e+00> : vector<16x1024xf32>
    %5 = tpu.matmul %3, %4, %cst {dimension_numbers = #tpu.dot_dimension_numbers<[1], [0], [0], [1], [0, 0, 1, 1], [], []>} : vector<16x256xf32>, vector<256x1024xf32>, vector<16x1024xf32> -> vector<16x1024xf32>
    %c0_4 = arith.constant 0 : index
    %c0_5 = arith.constant 0 : index
    %6 = vector.load %arg4[%c0_4, %c0_5] : memref<1x1024xf32, #tpu.memory_space<vmem>>, vector<1x1024xf32>
    %7 = vector.broadcast %6 : vector<1x1024xf32> to vector<16x1024xf32>
    %8 = arith.addf %5, %7 : vector<16x1024xf32>
    %9 = vector.extract_strided_slice %8 {offsets = [0, 0], sizes = [16, 512], strides = [1, 1]} : vector<16x1024xf32> to vector<16x512xf32>
    %10 = vector.extract_strided_slice %8 {offsets = [0, 512], sizes = [16, 512], strides = [1, 1]} : vector<16x1024xf32> to vector<16x512xf32>
    %11 = arith.negf %10 : vector<16x512xf32>
    %12 = math.exp %11 : vector<16x512xf32>
    %cst_6 = arith.constant 1.000000e+00 : f32
    %13 = vector.broadcast %cst_6 : f32 to vector<16x512xf32>
    %14 = arith.addf %13, %12 : vector<16x512xf32>
    %15 = arith.divf %13, %14 : vector<16x512xf32>
    %16 = arith.mulf %10, %15 : vector<16x512xf32>
    %17 = arith.mulf %9, %16 : vector<16x512xf32>
    %c0_7 = arith.constant 0 : index
    %c0_8 = arith.constant 0 : index
    %18 = vector.load %arg8[%c0_7, %c0_8] : memref<16x256xf32, #tpu.memory_space<vmem>>, vector<16x256xf32>
    %c0_9 = arith.constant 0 : index
    %c0_10 = arith.constant 0 : index
    %19 = vector.load %arg5[%c0_9, %c0_10] : memref<512x256xf32, #tpu.memory_space<vmem>>, vector<512x256xf32>
    %cst_11 = arith.constant dense<0.000000e+00> : vector<16x256xf32>
    %20 = tpu.matmul %17, %19, %cst_11 {dimension_numbers = #tpu.dot_dimension_numbers<[1], [0], [0], [1], [0, 0, 1, 1], [], []>} : vector<16x512xf32>, vector<512x256xf32>, vector<16x256xf32> -> vector<16x256xf32>
    %21 = arith.addf %18, %20 : vector<16x256xf32>
    %c0_12 = arith.constant 0 : index
    %c0_13 = arith.constant 0 : index
    %22 = vector.load %arg8[%c0_12, %c0_13] : memref<16x256xf32, #tpu.memory_space<vmem>>, vector<16x256xf32>
    tpu.vector_store %arg8[%c0_12, %c0_13], %21 {strides = array<i32>} : memref<16x256xf32, #tpu.memory_space<vmem>>, vector<16x256xf32>,
    %c0_i32_14 = arith.constant 0 : i32
    %23 = arith.cmpi eq, %arg1, %c0_i32_14 : i32
    %24 = arith.extui %23 : i1 to i32
    %c0_i32_15 = arith.constant 0 : i32
    %25 = arith.cmpi ne, %24, %c0_i32_15 : i32
    scf.if %25 {
      %c0_16 = arith.constant 0 : index
      %c0_17 = arith.constant 0 : index
      %26 = vector.load %arg8[%c0_16, %c0_17] : memref<16x256xf32, #tpu.memory_space<vmem>>, vector<16x256xf32>
      %c0_18 = arith.constant 0 : index
      %c0_19 = arith.constant 0 : index
      %27 = vector.load %arg6[%c0_18, %c0_19] : memref<1x256xf32, #tpu.memory_space<vmem>>, vector<1x256xf32>
      %28 = vector.broadcast %27 : vector<1x256xf32> to vector<16x256xf32>
      %29 = arith.addf %26, %28 : vector<16x256xf32>
      %c0_20 = arith.constant 0 : index
      %c0_21 = arith.constant 0 : index
      %30 = vector.load %arg7[%c0_20, %c0_21] : memref<16x256xf32, #tpu.memory_space<vmem>>, vector<16x256xf32>
      tpu.vector_store %arg7[%c0_20, %c0_21], %29 {strides = array<i32>} : memref<16x256xf32, #tpu.memory_space<vmem>>, vector<16x256xf32>,
    } else {
    }
    return
  }
  func.func @transform_0(%arg0: i32, %arg1: i32) -> (i32, i32) {
    %c0_i32 = arith.constant 0 : i32
    %c0_i32_0 = arith.constant 0 : i32
    return %arg0, %c0_i32 : i32, i32
  }
  func.func @transform_1(%arg0: i32, %arg1: i32) -> (i32, i32) {
    %c0_i32 = arith.constant 0 : i32
    %c0_i32_0 = arith.constant 0 : i32
    return %c0_i32, %arg1 : i32, i32
  }
  func.func @transform_2(%arg0: i32, %arg1: i32) -> (i32, i32) {
    %c0_i32 = arith.constant 0 : i32
    %c0_i32_0 = arith.constant 0 : i32
    return %c0_i32, %arg1 : i32, i32
  }
  func.func @transform_3(%arg0: i32, %arg1: i32) -> (i32, i32) {
    %c0_i32 = arith.constant 0 : i32
    %c0_i32_0 = arith.constant 0 : i32
    return %arg1, %c0_i32 : i32, i32
  }
  func.func @transform_4(%arg0: i32, %arg1: i32) -> (i32, i32) {
    %c0_i32 = arith.constant 0 : i32
    %c0_i32_0 = arith.constant 0 : i32
    %c0_i32_1 = arith.constant 0 : i32
    return %c0_i32, %c0_i32_0 : i32, i32
  }
  func.func @transform_5(%arg0: i32, %arg1: i32) -> (i32, i32) {
    %c0_i32 = arith.constant 0 : i32
    %c0_i32_0 = arith.constant 0 : i32
    return %arg0, %c0_i32 : i32, i32
  }
}

</mosaic_0001>

<bundles_post_ra>
// kernel: feed_forward_fused.1
= control target key start
LH: loop header
LB: loop body
LE: loop exit
PB: predicated region body
PF: predicated region fallthrough
CT: control target
= control target key end

     0   :  { %10 = vsyncpa [#allocation4], 0  ;;  %s1407_s0 = inlined_call_operand.hbm [shape: f32[16,256], index: 0, kind: input, shape index: {}]   ;;  %s1408_s1 = inlined_call_operand.hbm [shape: f32[256,1024], index: 1, kind: input, shape index: {}]   ;;  %s1409_s2 = inlined_call_operand.hbm [shape: f32[1,1024], index: 2, kind: input, shape index: {}]   ;;  %s1410_s3 = inlined_call_operand.hbm [shape: f32[512,256], index: 3, kind: input, shape index: {}]   ;;  %s1411_s4 = inlined_call_operand.vmem [shape: f32[1,256], index: 4, kind: input, shape index: {}]   ;;  %s1412_s5 = inlined_call_operand.hbm [shape: f32[16,256], index: 5, kind: output, shape index: {}]  }
   0x1   :  { %11 = vsyncpa [#allocation7], 0 }
   0x2   :  { %12 = vsyncpa [#allocation10], 0 }
   0x3   :  { %13 = vsyncpa [#allocation5], 0  ;;  %s1253_s18 = smov [#allocation6]  }
   0x4   :  { %s31_s19 = sshll.u32 %s1253_s18, 4  ;;  %s32_s19 = int_to_ptr.vmem [resolvable:$true] %s31_s19 }
   0x5   :  { %s1153_s20 = scalar_lea.vmem %s32_s19, 32768  ;;  %p1158_p1 = scmp.lt.s32.totalorder %s32_s19, %s32_s19 }
   0x6   :  { %p1154_p0 = scmp.ne.s32.totalorder %s32_s19, %s1153_s20  ;;  %p1159_p2 = scmp.lt.s32.totalorder %s1153_s20, %s1153_s20 }
   0x8   :  { %p1160_p3 = por %p1159_p2, %p1158_p1 }
   0xa   :  { %p1161_p4 = pnand %p1160_p3, %p1154_p0 }
   0xc   :  { %1164 = shalt.err (!%p1161_p4)
}
   0xd   :  { %s1254_s21 = smov 1024   ;;  %s1255_s22 = smov 64  }
   0xe   :  { %37 = dma.hbm_to_vmem [thread:$0]  %s1408_s1, 32768, %s32_s19, [#allocation7], %s1254_s21, %s1254_s21, %s1255_s22  }
   0xf   :  { %s1256_s25 = smov [#allocation3]  }
  0x10   :  { %s19_s26 = sshll.u32 %s1256_s25, 4  ;;  %s20_s26 = int_to_ptr.vmem [resolvable:$true] %s19_s26 }
  0x11   :  { %s1173_s27 = scalar_lea.vmem %s20_s26, 512  ;;  %p1178_p6 = scmp.lt.s32.totalorder %s20_s26, %s20_s26 }
  0x12   :  { %p1174_p5 = scmp.ne.s32.totalorder %s20_s26, %s1173_s27  ;;  %p1179_p7 = scmp.lt.s32.totalorder %s1173_s27, %s1173_s27 }
  0x14   :  { %p1180_p8 = por %p1179_p7, %p1178_p6 }
  0x16   :  { %p1181_p9 = pnand %p1180_p8, %p1174_p5 }
  0x18   :  { %1184 = shalt.err (!%p1181_p9)
}
  0x19   :  { %s1257_s28 = smov 256   ;;  %s1258_s29 = smov 16  }
  0x1a   :  { %25 = dma.hbm_to_vmem [thread:$0]  %s1407_s0, 512, %s20_s26, [#allocation4], %s1257_s28, %s1257_s28, %s1258_s29  }
  0x1b   :  { %s1259_s1 = smov [#allocation8]   ;;  %s1260_s8 = smov [#allocation9]  }
  0x1c   :  { %s44_s7 = sshll.u32 %s1259_s1, 4  ;;  %s53_s9 = sshll.u32 %s1260_s8, 4  ;;  %s45_s7 = int_to_ptr.vmem [resolvable:$true] %s44_s7  ;;  %s54_s9 = int_to_ptr.vmem [resolvable:$true] %s53_s9 }
  0x1d   :  { %s1193_s10 = scalar_lea.vmem %s45_s7, 128  ;;  %p1198_p11 = scmp.lt.s32.totalorder %s45_s7, %s45_s7 }
  0x1e   :  { %p1194_p10 = scmp.ne.s32.totalorder %s45_s7, %s1193_s10  ;;  %p1199_p12 = scmp.lt.s32.totalorder %s1193_s10, %s1193_s10 }
  0x20   :  { %p1200_p13 = por %p1199_p12, %p1198_p11 }
  0x22   :  { %p1201_p0 = pnand %p1200_p13, %p1194_p10 }
  0x24   :  { %1204 = shalt.err (!%p1201_p0)
}
  0x25   :  { %47 = dma.hbm_to_vmem [thread:$0]  %s1409_s2, 128, %s45_s7, [#allocation7]  }
  0x26   :  { %s1213_s13 = scalar_lea.vmem %s54_s9, 16384  ;;  %p1218_p2 = scmp.lt.s32.totalorder %s54_s9, %s54_s9 }
  0x27   :  { %p1214_p1 = scmp.ne.s32.totalorder %s54_s9, %s1213_s13  ;;  %p1219_p3 = scmp.lt.s32.totalorder %s1213_s13, %s1213_s13 }
  0x29   :  { %p1220_p4 = por %p1219_p3, %p1218_p2 }
  0x2b   :  { %p1221_p5 = pnand %p1220_p4, %p1214_p1 }
  0x2d   :  { %1224 = shalt.err (!%p1221_p5)
}
  0x2e   :  { %59 = dma.hbm_to_vmem [thread:$0]  %s1410_s3, 16384, %s54_s9, [#allocation10], %s1257_s28, %s1257_s28, %s1258_s29  }
  0x2f   :  { %1245 = dma.done.wait [#allocation4], 512  }
  0x30   :  { %1246 = vsyncadd [#allocation4], 4294966784 }
  0x31   :  { %1247 = dma.done.wait [#allocation7], 32896  }
  0x32   :  { %1248 = vsyncadd [#allocation7], 4294934400 }
  0x33   :  { %1249 = dma.done.wait [#allocation10], 16384  }
  0x34   :  { %1250 = vsyncadd [#allocation10], 4294950912  ;;  %v207_v0 = vld [vmem:[#allocation6 + $0x3c8] sm:$0xff]  ;;  %v209_v1 = vld [vmem:[#allocation6 + $0x3d8] sm:$0xff]  ;;  %s1261_s15 = smov [#allocation11]  }
  0x35   :  { %v206_v2 = vld [vmem:[#allocation6 + $0x3c0] sm:$0xff]  ;;  %384 = vmatprep.subr.mxu0 %v207_v0  ;;  %461 = vmatprep.subr.mxu1 %v209_v1  ;;  %v208_v3 = vld [vmem:[#allocation6 + $0x3d0] sm:$0xff]  ;;  %v199_v4 = vld [vmem:[#allocation6 + $0x388] sm:$0xff]  ;;  %s1082_s16 = sshll.u32 %s1261_s15, 4  ;;  %s1083_s16 = int_to_ptr.vmem [resolvable:$true] %s1082_s16 }
  0x36   :  { %v201_v5 = vld [vmem:[#allocation6 + $0x398] sm:$0xff]  ;;  %385 = vmatpush1.msra.mxu0 %v206_v2  ;;  %462 = vmatpush1.msra.mxu1 %v208_v3  ;;  %v198_v6 = vld [vmem:[#allocation6 + $0x380] sm:$0xff]  ;;  %v200_v7 = vld [vmem:[#allocation6 + $0x390] sm:$0xff]  ;;  %p1230_p7 = scmp.lt.s32.totalorder %s1083_s16, %s1083_s16 }
  0x37   :  { %v191_v8 = vld [vmem:[#allocation6 + $0x348] sm:$0xff]  ;;  %386 = vmatprep.subr.mxu0 %v199_v4  ;;  %463 = vmatprep.subr.mxu1 %v201_v5  ;;  %v193_v9 = vld [vmem:[#allocation6 + $0x358] sm:$0xff]  ;;  %v190_v10 = vld [vmem:[#allocation6 + $0x340] sm:$0xff] }
  0x38   :  { %v192_v11 = vld [vmem:[#allocation6 + $0x350] sm:$0xff]  ;;  %387 = vmatpush1.msra.mxu0 %v198_v6  ;;  %464 = vmatpush1.msra.mxu1 %v200_v7  ;;  %v183_v12 = vld [vmem:[#allocation6 + $0x308] sm:$0xff]  ;;  %v185_v13 = vld [vmem:[#allocation6 + $0x318] sm:$0xff] }
  0x39   :  { %388 = vmatprep.subr.mxu0 %v191_v8  ;;  %465 = vmatprep.subr.mxu1 %v193_v9  ;;  %v182_v14 = vld [vmem:[#allocation6 + $0x300] sm:$0xff]  ;;  %v184_v15 = vld [vmem:[#allocation6 + $0x310] sm:$0xff]  ;;  %v175_v16 = vld [vmem:[#allocation6 + $0x2c8] sm:$0xff] }
  0x3a   :  { %389 = vmatpush1.msra.mxu0 %v190_v10  ;;  %466 = vmatpush1.msra.mxu1 %v192_v11  ;;  %v177_v17 = vld [vmem:[#allocation6 + $0x2d8] sm:$0xff]  ;;  %v174_v18 = vld [vmem:[#allocation6 + $0x2c0] sm:$0xff]  ;;  %v176_v19 = vld [vmem:[#allocation6 + $0x2d0] sm:$0xff] }
  0x3b   :  { %390 = vmatprep.subr.mxu0 %v183_v12  ;;  %467 = vmatprep.subr.mxu1 %v185_v13  ;;  %v167_v20 = vld [vmem:[#allocation6 + $0x288] sm:$0xff]  ;;  %v169_v21 = vld [vmem:[#allocation6 + $0x298] sm:$0xff]  ;;  %v166_v22 = vld [vmem:[#allocation6 + $0x280] sm:$0xff] }
  0x3c   :  { %391 = vmatpush1.msra.mxu0 %v182_v14  ;;  %468 = vmatpush1.msra.mxu1 %v184_v15  ;;  %v168_v23 = vld [vmem:[#allocation6 + $0x290] sm:$0xff]  ;;  %v159_v24 = vld [vmem:[#allocation6 + $0x248] sm:$0xff]  ;;  %v161_v25 = vld [vmem:[#allocation6 + $0x258] sm:$0xff] }
  0x3d   :  { %392 = vmatprep.subr.mxu0 %v175_v16  ;;  %469 = vmatprep.subr.mxu1 %v177_v17  ;;  %v158_v26 = vld [vmem:[#allocation6 + $0x240] sm:$0xff]  ;;  %v160_v27 = vld [vmem:[#allocation6 + $0x250] sm:$0xff]  ;;  %v151_v28 = vld [vmem:[#allocation6 + $0x208] sm:$0xff] }
  0x3e   :  { %393 = vmatpush1.msra.mxu0 %v174_v18  ;;  %470 = vmatpush1.msra.mxu1 %v176_v19  ;;  %v153_v29 = vld [vmem:[#allocation6 + $0x218] sm:$0xff]  ;;  %v150_v30 = vld [vmem:[#allocation6 + $0x200] sm:$0xff]  ;;  %v152_v31 = vld [vmem:[#allocation6 + $0x210] sm:$0xff] }
  0x3f   :  { %394 = vmatprep.subr.mxu0 %v167_v20  ;;  %471 = vmatprep.subr.mxu1 %v169_v21  ;;  %v143_v32 = vld [vmem:[#allocation6 + $0x1c8] sm:$0xff]  ;;  %v145_v33 = vld [vmem:[#allocation6 + $0x1d8] sm:$0xff]  ;;  %v142_v34 = vld [vmem:[#allocation6 + $0x1c0] sm:$0xff] }
  0x40   :  { %395 = vmatpush1.msra.mxu0 %v166_v22  ;;  %472 = vmatpush1.msra.mxu1 %v168_v23  ;;  %v144_v35 = vld [vmem:[#allocation6 + $0x1d0] sm:$0xff]  ;;  %v135_v36 = vld [vmem:[#allocation6 + $0x188] sm:$0xff]  ;;  %v137_v37 = vld [vmem:[#allocation6 + $0x198] sm:$0xff] }
  0x41   :  { %396 = vmatprep.subr.mxu0 %v159_v24  ;;  %473 = vmatprep.subr.mxu1 %v161_v25  ;;  %v134_v38 = vld [vmem:[#allocation6 + $0x180] sm:$0xff]  ;;  %v136_v39 = vld [vmem:[#allocation6 + $0x190] sm:$0xff]  ;;  %v127_v40 = vld [vmem:[#allocation6 + $0x148] sm:$0xff] }
  0x42   :  { %397 = vmatpush1.msra.mxu0 %v158_v26  ;;  %474 = vmatpush1.msra.mxu1 %v160_v27  ;;  %v129_v41 = vld [vmem:[#allocation6 + $0x158] sm:$0xff]  ;;  %v126_v42 = vld [vmem:[#allocation6 + $0x140] sm:$0xff]  ;;  %v128_v43 = vld [vmem:[#allocation6 + $0x150] sm:$0xff] }
  0x43   :  { %398 = vmatprep.subr.mxu0 %v151_v28  ;;  %475 = vmatprep.subr.mxu1 %v153_v29  ;;  %v119_v44 = vld [vmem:[#allocation6 + $0x108] sm:$0xff]  ;;  %v121_v45 = vld [vmem:[#allocation6 + $0x118] sm:$0xff]  ;;  %v118_v46 = vld [vmem:[#allocation6 + $0x100] sm:$0xff] }
  0x44   :  { %399 = vmatpush1.msra.mxu0 %v150_v30  ;;  %476 = vmatpush1.msra.mxu1 %v152_v31  ;;  %v120_v47 = vld [vmem:[#allocation6 + $0x110] sm:$0xff]  ;;  %v111_v48 = vld [vmem:[#allocation6 + $0xc8] sm:$0xff]  ;;  %v113_v49 = vld [vmem:[#allocation6 + $0xd8] sm:$0xff] }
  0x45   :  { %400 = vmatprep.subr.mxu0 %v143_v32  ;;  %477 = vmatprep.subr.mxu1 %v145_v33  ;;  %v110_v50 = vld [vmem:[#allocation6 + $0xc0] sm:$0xff]  ;;  %v112_v51 = vld [vmem:[#allocation6 + $0xd0] sm:$0xff]  ;;  %v103_v52 = vld [vmem:[#allocation6 + $0x88] sm:$0xff] }
  0x46   :  { %401 = vmatpush1.msra.mxu0 %v142_v34  ;;  %478 = vmatpush1.msra.mxu1 %v144_v35  ;;  %v105_v53 = vld [vmem:[#allocation6 + $0x98] sm:$0xff]  ;;  %v102_v54 = vld [vmem:[#allocation6 + $0x80] sm:$0xff]  ;;  %v104_v55 = vld [vmem:[#allocation6 + $0x90] sm:$0xff] }
  0x47   :  { %402 = vmatprep.subr.mxu0 %v135_v36  ;;  %479 = vmatprep.subr.mxu1 %v137_v37  ;;  %v95_v56 = vld [vmem:[#allocation6 + $0x48] sm:$0xff]  ;;  %v97_v57 = vld [vmem:[#allocation6 + $0x58] sm:$0xff]  ;;  %v94_v58 = vld [vmem:[#allocation6 + $0x40] sm:$0xff] }
  0x48   :  { %403 = vmatpush1.msra.mxu0 %v134_v38  ;;  %480 = vmatpush1.msra.mxu1 %v136_v39  ;;  %v96_v59 = vld [vmem:[#allocation6 + $0x50] sm:$0xff]  ;;  %v87_v60 = vld [vmem:[#allocation6 + $0x8] sm:$0xff]  ;;  %v89_v61 = vld [vmem:[#allocation6 + $0x18] sm:$0xff] }
  0x49   :  { %404 = vmatprep.subr.mxu0 %v127_v40  ;;  %481 = vmatprep.subr.mxu1 %v129_v41  ;;  %v86_v62 = vld [vmem:[#allocation6] sm:$0xff]  ;;  %v88_v63 = vld [vmem:[#allocation6 + $0x10] sm:$0xff]  ;;  %v335_v0 = vld [vmem:[#allocation6 + $0x7c8] sm:$0xff] }
  0x4a   :  { %405 = vmatpush1.msra.mxu0 %v126_v42  ;;  %482 = vmatpush1.msra.mxu1 %v128_v43  ;;  %v337_v1 = vld [vmem:[#allocation6 + $0x7d8] sm:$0xff]  ;;  %v334_v2 = vld [vmem:[#allocation6 + $0x7c0] sm:$0xff]  ;;  %v336_v3 = vld [vmem:[#allocation6 + $0x7d0] sm:$0xff] }
  0x4b   :  { %406 = vmatprep.subr.mxu0 %v119_v44  ;;  %483 = vmatprep.subr.mxu1 %v121_v45  ;;  %v327_v4 = vld [vmem:[#allocation6 + $0x788] sm:$0xff]  ;;  %v329_v5 = vld [vmem:[#allocation6 + $0x798] sm:$0xff]  ;;  %v326_v6 = vld [vmem:[#allocation6 + $0x780] sm:$0xff] }
  0x4c   :  { %407 = vmatpush1.msra.mxu0 %v118_v46  ;;  %484 = vmatpush1.msra.mxu1 %v120_v47  ;;  %v328_v7 = vld [vmem:[#allocation6 + $0x790] sm:$0xff]  ;;  %v319_v8 = vld [vmem:[#allocation6 + $0x748] sm:$0xff]  ;;  %v321_v9 = vld [vmem:[#allocation6 + $0x758] sm:$0xff] }
  0x4d   :  { %408 = vmatprep.subr.mxu0 %v111_v48  ;;  %485 = vmatprep.subr.mxu1 %v113_v49  ;;  %v318_v10 = vld [vmem:[#allocation6 + $0x740] sm:$0xff]  ;;  %v320_v11 = vld [vmem:[#allocation6 + $0x750] sm:$0xff]  ;;  %v311_v12 = vld [vmem:[#allocation6 + $0x708] sm:$0xff] }
  0x4e   :  { %409 = vmatpush1.msra.mxu0 %v110_v50  ;;  %486 = vmatpush1.msra.mxu1 %v112_v51  ;;  %v313_v13 = vld [vmem:[#allocation6 + $0x718] sm:$0xff]  ;;  %v310_v14 = vld [vmem:[#allocation6 + $0x700] sm:$0xff]  ;;  %v312_v15 = vld [vmem:[#allocation6 + $0x710] sm:$0xff] }
  0x4f   :  { %410 = vmatprep.subr.mxu0 %v103_v52  ;;  %487 = vmatprep.subr.mxu1 %v105_v53  ;;  %v303_v16 = vld [vmem:[#allocation6 + $0x6c8] sm:$0xff]  ;;  %v305_v17 = vld [vmem:[#allocation6 + $0x6d8] sm:$0xff]  ;;  %v302_v18 = vld [vmem:[#allocation6 + $0x6c0] sm:$0xff] }
  0x50   :  { %411 = vmatpush1.msra.mxu0 %v102_v54  ;;  %488 = vmatpush1.msra.mxu1 %v104_v55  ;;  %v304_v19 = vld [vmem:[#allocation6 + $0x6d0] sm:$0xff]  ;;  %v295_v20 = vld [vmem:[#allocation6 + $0x688] sm:$0xff]  ;;  %v297_v21 = vld [vmem:[#allocation6 + $0x698] sm:$0xff] }
  0x51   :  { %412 = vmatprep.subr.mxu0 %v95_v56  ;;  %489 = vmatprep.subr.mxu1 %v97_v57  ;;  %v294_v22 = vld [vmem:[#allocation6 + $0x680] sm:$0xff]  ;;  %v296_v23 = vld [vmem:[#allocation6 + $0x690] sm:$0xff]  ;;  %v287_v24 = vld [vmem:[#allocation6 + $0x648] sm:$0xff] }
  0x52   :  { %413 = vmatpush1.msra.mxu0 %v94_v58  ;;  %490 = vmatpush1.msra.mxu1 %v96_v59  ;;  %v289_v25 = vld [vmem:[#allocation6 + $0x658] sm:$0xff]  ;;  %v286_v26 = vld [vmem:[#allocation6 + $0x640] sm:$0xff]  ;;  %v288_v27 = vld [vmem:[#allocation6 + $0x650] sm:$0xff] }
  0x53   :  { %414 = vmatprep.subr.mxu0 %v87_v60  ;;  %491 = vmatprep.subr.mxu1 %v89_v61  ;;  %v279_v28 = vld [vmem:[#allocation6 + $0x608] sm:$0xff]  ;;  %v281_v29 = vld [vmem:[#allocation6 + $0x618] sm:$0xff]  ;;  %v278_v30 = vld [vmem:[#allocation6 + $0x600] sm:$0xff] }
  0x54   :  { %415 = vmatpush1.msra.mxu0 %v86_v62  ;;  %492 = vmatpush1.msra.mxu1 %v88_v63  ;;  %v280_v31 = vld [vmem:[#allocation6 + $0x610] sm:$0xff]  ;;  %v271_v32 = vld [vmem:[#allocation6 + $0x5c8] sm:$0xff]  ;;  %v273_v33 = vld [vmem:[#allocation6 + $0x5d8] sm:$0xff] }
  0x55   :  { %416 = vmatprep.subr.mxu0 %v335_v0  ;;  %493 = vmatprep.subr.mxu1 %v337_v1  ;;  %v270_v34 = vld [vmem:[#allocation6 + $0x5c0] sm:$0xff]  ;;  %v272_v35 = vld [vmem:[#allocation6 + $0x5d0] sm:$0xff]  ;;  %v263_v36 = vld [vmem:[#allocation6 + $0x588] sm:$0xff] }
  0x56   :  { %417 = vmatpush2.msra.mxu0 %v334_v2  ;;  %494 = vmatpush2.msra.mxu1 %v336_v3  ;;  %v265_v37 = vld [vmem:[#allocation6 + $0x598] sm:$0xff]  ;;  %v262_v38 = vld [vmem:[#allocation6 + $0x580] sm:$0xff]  ;;  %v264_v39 = vld [vmem:[#allocation6 + $0x590] sm:$0xff] }
  0x57   :  { %418 = vmatprep.subr.mxu0 %v327_v4  ;;  %495 = vmatprep.subr.mxu1 %v329_v5  ;;  %v255_v40 = vld [vmem:[#allocation6 + $0x548] sm:$0xff]  ;;  %v257_v41 = vld [vmem:[#allocation6 + $0x558] sm:$0xff]  ;;  %v254_v42 = vld [vmem:[#allocation6 + $0x540] sm:$0xff] }
  0x58   :  { %419 = vmatpush2.msra.mxu0 %v326_v6  ;;  %496 = vmatpush2.msra.mxu1 %v328_v7  ;;  %v256_v43 = vld [vmem:[#allocation6 + $0x550] sm:$0xff]  ;;  %v247_v44 = vld [vmem:[#allocation6 + $0x508] sm:$0xff]  ;;  %v249_v45 = vld [vmem:[#allocation6 + $0x518] sm:$0xff] }
  0x59   :  { %420 = vmatprep.subr.mxu0 %v319_v8  ;;  %497 = vmatprep.subr.mxu1 %v321_v9  ;;  %v246_v46 = vld [vmem:[#allocation6 + $0x500] sm:$0xff]  ;;  %v248_v47 = vld [vmem:[#allocation6 + $0x510] sm:$0xff]  ;;  %v239_v48 = vld [vmem:[#allocation6 + $0x4c8] sm:$0xff] }
  0x5a   :  { %421 = vmatpush2.msra.mxu0 %v318_v10  ;;  %498 = vmatpush2.msra.mxu1 %v320_v11  ;;  %v241_v49 = vld [vmem:[#allocation6 + $0x4d8] sm:$0xff]  ;;  %v238_v50 = vld [vmem:[#allocation6 + $0x4c0] sm:$0xff]  ;;  %v240_v51 = vld [vmem:[#allocation6 + $0x4d0] sm:$0xff] }
  0x5b   :  { %422 = vmatprep.subr.mxu0 %v311_v12  ;;  %499 = vmatprep.subr.mxu1 %v313_v13  ;;  %v231_v52 = vld [vmem:[#allocation6 + $0x488] sm:$0xff]  ;;  %v233_v53 = vld [vmem:[#allocation6 + $0x498] sm:$0xff]  ;;  %v230_v54 = vld [vmem:[#allocation6 + $0x480] sm:$0xff] }
  0x5c   :  { %423 = vmatpush2.msra.mxu0 %v310_v14  ;;  %500 = vmatpush2.msra.mxu1 %v312_v15  ;;  %v232_v55 = vld [vmem:[#allocation6 + $0x490] sm:$0xff]  ;;  %v223_v56 = vld [vmem:[#allocation6 + $0x448] sm:$0xff]  ;;  %v225_v57 = vld [vmem:[#allocation6 + $0x458] sm:$0xff] }
  0x5d   :  { %424 = vmatprep.subr.mxu0 %v303_v16  ;;  %501 = vmatprep.subr.mxu1 %v305_v17  ;;  %v222_v58 = vld [vmem:[#allocation6 + $0x440] sm:$0xff]  ;;  %v224_v59 = vld [vmem:[#allocation6 + $0x450] sm:$0xff]  ;;  %v215_v60 = vld [vmem:[#allocation6 + $0x408] sm:$0xff] }
  0x5e   :  { %425 = vmatpush2.msra.mxu0 %v302_v18  ;;  %502 = vmatpush2.msra.mxu1 %v304_v19  ;;  %v217_v61 = vld [vmem:[#allocation6 + $0x418] sm:$0xff]  ;;  %v214_v62 = vld [vmem:[#allocation6 + $0x400] sm:$0xff]  ;;  %v1310_v63 = vld [vmem:[#allocation3 + $0x8] sm:$0xff] }
  0x5f   :  { %426 = vmatprep.subr.mxu0 %v295_v20  ;;  %503 = vmatprep.subr.mxu1 %v297_v21  ;;  %v216_v0 = vld [vmem:[#allocation6 + $0x410] sm:$0xff]  ;;  %v1312_v1 = vld [vmem:[#allocation3] sm:$0xff]  ;;  %v211_v2 = vld [vmem:[#allocation6 + $0x3e8] sm:$0xff] }
  0x60   :  { %427 = vmatpush2.msra.mxu0 %v294_v22  ;;  %504 = vmatpush2.msra.mxu1 %v296_v23  ;;  %v213_v3 = vld [vmem:[#allocation6 + $0x3f8] sm:$0xff]  ;;  %v210_v4 = vld [vmem:[#allocation6 + $0x3e0] sm:$0xff]  ;;  %v212_v5 = vld [vmem:[#allocation6 + $0x3f0] sm:$0xff] }
  0x61   :  { %428 = vmatprep.subr.mxu0 %v287_v24  ;;  %505 = vmatprep.subr.mxu1 %v289_v25  ;;  %v203_v6 = vld [vmem:[#allocation6 + $0x3a8] sm:$0xff]  ;;  %v205_v7 = vld [vmem:[#allocation6 + $0x3b8] sm:$0xff]  ;;  %v202_v8 = vld [vmem:[#allocation6 + $0x3a0] sm:$0xff] }
  0x62   :  { %429 = vmatpush2.msra.mxu0 %v286_v26  ;;  %506 = vmatpush2.msra.mxu1 %v288_v27  ;;  %v204_v9 = vld [vmem:[#allocation6 + $0x3b0] sm:$0xff]  ;;  %v195_v10 = vld [vmem:[#allocation6 + $0x368] sm:$0xff]  ;;  %v197_v11 = vld [vmem:[#allocation6 + $0x378] sm:$0xff] }
  0x63   :  { %430 = vmatprep.subr.mxu0 %v279_v28  ;;  %507 = vmatprep.subr.mxu1 %v281_v29  ;;  %v194_v12 = vld [vmem:[#allocation6 + $0x360] sm:$0xff]  ;;  %v196_v13 = vld [vmem:[#allocation6 + $0x370] sm:$0xff]  ;;  %v187_v14 = vld [vmem:[#allocation6 + $0x328] sm:$0xff] }
  0x64   :  { %431 = vmatpush2.msra.mxu0 %v278_v30  ;;  %508 = vmatpush2.msra.mxu1 %v280_v31  ;;  %v189_v15 = vld [vmem:[#allocation6 + $0x338] sm:$0xff]  ;;  %v186_v16 = vld [vmem:[#allocation6 + $0x320] sm:$0xff]  ;;  %v188_v17 = vld [vmem:[#allocation6 + $0x330] sm:$0xff] }
  0x65   :  { %432 = vmatprep.subr.mxu0 %v271_v32  ;;  %509 = vmatprep.subr.mxu1 %v273_v33  ;;  %v179_v18 = vld [vmem:[#allocation6 + $0x2e8] sm:$0xff]  ;;  %v181_v19 = vld [vmem:[#allocation6 + $0x2f8] sm:$0xff]  ;;  %v178_v20 = vld [vmem:[#allocation6 + $0x2e0] sm:$0xff] }
  0x66   :  { %433 = vmatpush2.msra.mxu0 %v270_v34  ;;  %510 = vmatpush2.msra.mxu1 %v272_v35  ;;  %v180_v21 = vld [vmem:[#allocation6 + $0x2f0] sm:$0xff]  ;;  %v171_v22 = vld [vmem:[#allocation6 + $0x2a8] sm:$0xff]  ;;  %v173_v23 = vld [vmem:[#allocation6 + $0x2b8] sm:$0xff] }
  0x67   :  { %434 = vmatprep.subr.mxu0 %v263_v36  ;;  %511 = vmatprep.subr.mxu1 %v265_v37  ;;  %v170_v24 = vld [vmem:[#allocation6 + $0x2a0] sm:$0xff]  ;;  %v172_v25 = vld [vmem:[#allocation6 + $0x2b0] sm:$0xff]  ;;  %v163_v26 = vld [vmem:[#allocation6 + $0x268] sm:$0xff] }
  0x68   :  { %435 = vmatpush2.msra.mxu0 %v262_v38  ;;  %512 = vmatpush2.msra.mxu1 %v264_v39  ;;  %v165_v27 = vld [vmem:[#allocation6 + $0x278] sm:$0xff]  ;;  %v162_v28 = vld [vmem:[#allocation6 + $0x260] sm:$0xff]  ;;  %v164_v29 = vld [vmem:[#allocation6 + $0x270] sm:$0xff] }
  0x69   :  { %436 = vmatprep.subr.mxu0 %v255_v40  ;;  %513 = vmatprep.subr.mxu1 %v257_v41  ;;  %v155_v30 = vld [vmem:[#allocation6 + $0x228] sm:$0xff]  ;;  %v157_v31 = vld [vmem:[#allocation6 + $0x238] sm:$0xff]  ;;  %v154_v32 = vld [vmem:[#allocation6 + $0x220] sm:$0xff] }
  0x6a   :  { %437 = vmatpush2.msra.mxu0 %v254_v42  ;;  %514 = vmatpush2.msra.mxu1 %v256_v43  ;;  %v156_v33 = vld [vmem:[#allocation6 + $0x230] sm:$0xff]  ;;  %v147_v34 = vld [vmem:[#allocation6 + $0x1e8] sm:$0xff]  ;;  %v149_v35 = vld [vmem:[#allocation6 + $0x1f8] sm:$0xff] }
  0x6b   :  { %438 = vmatprep.subr.mxu0 %v247_v44  ;;  %515 = vmatprep.subr.mxu1 %v249_v45  ;;  %v146_v36 = vld [vmem:[#allocation6 + $0x1e0] sm:$0xff]  ;;  %v148_v37 = vld [vmem:[#allocation6 + $0x1f0] sm:$0xff]  ;;  %v139_v38 = vld [vmem:[#allocation6 + $0x1a8] sm:$0xff] }
  0x6c   :  { %439 = vmatpush2.msra.mxu0 %v246_v46  ;;  %516 = vmatpush2.msra.mxu1 %v248_v47  ;;  %v141_v39 = vld [vmem:[#allocation6 + $0x1b8] sm:$0xff]  ;;  %v138_v40 = vld [vmem:[#allocation6 + $0x1a0] sm:$0xff]  ;;  %v140_v41 = vld [vmem:[#allocation6 + $0x1b0] sm:$0xff] }
  0x6d   :  { %440 = vmatprep.subr.mxu0 %v239_v48  ;;  %517 = vmatprep.subr.mxu1 %v241_v49  ;;  %v131_v42 = vld [vmem:[#allocation6 + $0x168] sm:$0xff]  ;;  %v133_v43 = vld [vmem:[#allocation6 + $0x178] sm:$0xff]  ;;  %v130_v44 = vld [vmem:[#allocation6 + $0x160] sm:$0xff] }
  0x6e   :  { %441 = vmatpush2.msra.mxu0 %v238_v50  ;;  %518 = vmatpush2.msra.mxu1 %v240_v51  ;;  %v132_v45 = vld [vmem:[#allocation6 + $0x170] sm:$0xff]  ;;  %v123_v46 = vld [vmem:[#allocation6 + $0x128] sm:$0xff]  ;;  %v125_v47 = vld [vmem:[#allocation6 + $0x138] sm:$0xff] }
  0x6f   :  { %442 = vmatprep.subr.mxu0 %v231_v52  ;;  %519 = vmatprep.subr.mxu1 %v233_v53  ;;  %v122_v48 = vld [vmem:[#allocation6 + $0x120] sm:$0xff]  ;;  %v124_v49 = vld [vmem:[#allocation6 + $0x130] sm:$0xff]  ;;  %v115_v50 = vld [vmem:[#allocation6 + $0xe8] sm:$0xff] }
  0x70   :  { %443 = vmatpush2.msra.mxu0 %v230_v54  ;;  %520 = vmatpush2.msra.mxu1 %v232_v55  ;;  %v117_v51 = vld [vmem:[#allocation6 + $0xf8] sm:$0xff]  ;;  %v114_v52 = vld [vmem:[#allocation6 + $0xe0] sm:$0xff]  ;;  %v116_v53 = vld [vmem:[#allocation6 + $0xf0] sm:$0xff] }
  0x71   :  { %444 = vmatprep.subr.mxu0 %v223_v56  ;;  %521 = vmatprep.subr.mxu1 %v225_v57  ;;  %v107_v54 = vld [vmem:[#allocation6 + $0xa8] sm:$0xff]  ;;  %v109_v55 = vld [vmem:[#allocation6 + $0xb8] sm:$0xff]  ;;  %v106_v56 = vld [vmem:[#allocation6 + $0xa0] sm:$0xff] }
  0x72   :  { %445 = vmatpush2.msra.mxu0 %v222_v58  ;;  %522 = vmatpush2.msra.mxu1 %v224_v59  ;;  %v108_v57 = vld [vmem:[#allocation6 + $0xb0] sm:$0xff]  ;;  %v99_v58 = vld [vmem:[#allocation6 + $0x68] sm:$0xff]  ;;  %v101_v59 = vld [vmem:[#allocation6 + $0x78] sm:$0xff] }
  0x73   :  { %446 = vmatprep.subr.mxu0 %v215_v60  ;;  %523 = vmatprep.subr.mxu1 %v217_v61  ;;  %v98_v60 = vld [vmem:[#allocation6 + $0x60] sm:$0xff]  ;;  %v100_v61 = vld [vmem:[#allocation6 + $0x70] sm:$0xff] }
  0x74   :  { %447 = vmatpush2.msra.mxu0 %v214_v62  ;;  %448 = vmatprep.mubr.f32.mxu0 %v1310_v63  ;;  %v91_v62 = vld [vmem:[#allocation6 + $0x28] sm:$0xff] }
  0x75   :  { %524 = vmatpush2.msra.mxu1 %v216_v0  ;;  %525 = vmatprep.mubr.f32.mxu1 %v1310_v63  ;;  %v93_v0 = vld [vmem:[#allocation6 + $0x38] sm:$0xff] }
  0x76   :  { %449 = vmatmul.mubr.f32.vlgmr.msra.gmra.mxu0 %v1312_v1  ;;  %526 = vmatmul.mubr.f32.vlgmr.msra.gmra.mxu1 %v1312_v1 }
  0x77   :  { %538 = vmatprep.subr.mxu0 %v211_v2  ;;  %615 = vmatprep.subr.mxu1 %v213_v3  ;;  %v90_v2 = vld [vmem:[#allocation6 + $0x20] sm:$0xff]  ;;  %v92_v3 = vld [vmem:[#allocation6 + $0x30] sm:$0xff] }
  0x78   :  { %539 = vmatpush1.msra.mxu0 %v210_v4  ;;  %616 = vmatpush1.msra.mxu1 %v212_v5  ;;  %v339_v4 = vld [vmem:[#allocation6 + $0x7e8] sm:$0xff]  ;;  %v341_v5 = vld [vmem:[#allocation6 + $0x7f8] sm:$0xff] }
  0x79   :  { %540 = vmatprep.subr.mxu0 %v203_v6  ;;  %617 = vmatprep.subr.mxu1 %v205_v7  ;;  %v338_v6 = vld [vmem:[#allocation6 + $0x7e0] sm:$0xff]  ;;  %v340_v7 = vld [vmem:[#allocation6 + $0x7f0] sm:$0xff] }
  0x7a   :  { %541 = vmatpush1.msra.mxu0 %v202_v8  ;;  %618 = vmatpush1.msra.mxu1 %v204_v9  ;;  %v331_v8 = vld [vmem:[#allocation6 + $0x7a8] sm:$0xff]  ;;  %v333_v9 = vld [vmem:[#allocation6 + $0x7b8] sm:$0xff] }
  0x7b   :  { %542 = vmatprep.subr.mxu0 %v195_v10  ;;  %619 = vmatprep.subr.mxu1 %v197_v11  ;;  %v330_v10 = vld [vmem:[#allocation6 + $0x7a0] sm:$0xff]  ;;  %v332_v11 = vld [vmem:[#allocation6 + $0x7b0] sm:$0xff] }
  0x7c   :  { %543 = vmatpush1.msra.mxu0 %v194_v12  ;;  %620 = vmatpush1.msra.mxu1 %v196_v13  ;;  %v323_v12 = vld [vmem:[#allocation6 + $0x768] sm:$0xff]  ;;  %v325_v13 = vld [vmem:[#allocation6 + $0x778] sm:$0xff] }
  0x7d   :  { %544 = vmatprep.subr.mxu0 %v187_v14  ;;  %621 = vmatprep.subr.mxu1 %v189_v15  ;;  %v322_v14 = vld [vmem:[#allocation6 + $0x760] sm:$0xff]  ;;  %v324_v15 = vld [vmem:[#allocation6 + $0x770] sm:$0xff] }
  0x7e   :  { %545 = vmatpush1.msra.mxu0 %v186_v16  ;;  %622 = vmatpush1.msra.mxu1 %v188_v17  ;;  %v315_v16 = vld [vmem:[#allocation6 + $0x728] sm:$0xff]  ;;  %v317_v17 = vld [vmem:[#allocation6 + $0x738] sm:$0xff] }
  0x7f   :  { %546 = vmatprep.subr.mxu0 %v179_v18  ;;  %623 = vmatprep.subr.mxu1 %v181_v19  ;;  %v314_v18 = vld [vmem:[#allocation6 + $0x720] sm:$0xff]  ;;  %v316_v19 = vld [vmem:[#allocation6 + $0x730] sm:$0xff] }
  0x80   :  { %547 = vmatpush1.msra.mxu0 %v178_v20  ;;  %624 = vmatpush1.msra.mxu1 %v180_v21  ;;  %v307_v20 = vld [vmem:[#allocation6 + $0x6e8] sm:$0xff]  ;;  %v309_v21 = vld [vmem:[#allocation6 + $0x6f8] sm:$0xff] }
  0x81   :  { %548 = vmatprep.subr.mxu0 %v171_v22  ;;  %625 = vmatprep.subr.mxu1 %v173_v23  ;;  %v306_v22 = vld [vmem:[#allocation6 + $0x6e0] sm:$0xff]  ;;  %v308_v23 = vld [vmem:[#allocation6 + $0x6f0] sm:$0xff] }
  0x82   :  { %549 = vmatpush1.msra.mxu0 %v170_v24  ;;  %626 = vmatpush1.msra.mxu1 %v172_v25  ;;  %v299_v24 = vld [vmem:[#allocation6 + $0x6a8] sm:$0xff]  ;;  %v301_v25 = vld [vmem:[#allocation6 + $0x6b8] sm:$0xff] }
  0x83   :  { %550 = vmatprep.subr.mxu0 %v163_v26  ;;  %627 = vmatprep.subr.mxu1 %v165_v27  ;;  %v298_v26 = vld [vmem:[#allocation6 + $0x6a0] sm:$0xff]  ;;  %v300_v27 = vld [vmem:[#allocation6 + $0x6b0] sm:$0xff] }
  0x84   :  { %551 = vmatpush1.msra.mxu0 %v162_v28  ;;  %628 = vmatpush1.msra.mxu1 %v164_v29  ;;  %v291_v28 = vld [vmem:[#allocation6 + $0x668] sm:$0xff]  ;;  %v293_v29 = vld [vmem:[#allocation6 + $0x678] sm:$0xff] }
  0x85   :  { %552 = vmatprep.subr.mxu0 %v155_v30  ;;  %629 = vmatprep.subr.mxu1 %v157_v31  ;;  %v290_v30 = vld [vmem:[#allocation6 + $0x660] sm:$0xff]  ;;  %v292_v31 = vld [vmem:[#allocation6 + $0x670] sm:$0xff] }
  0x86   :  { %553 = vmatpush1.msra.mxu0 %v154_v32  ;;  %630 = vmatpush1.msra.mxu1 %v156_v33  ;;  %v283_v32 = vld [vmem:[#allocation6 + $0x628] sm:$0xff]  ;;  %v285_v33 = vld [vmem:[#allocation6 + $0x638] sm:$0xff] }
  0x87   :  { %554 = vmatprep.subr.mxu0 %v147_v34  ;;  %631 = vmatprep.subr.mxu1 %v149_v35  ;;  %v282_v34 = vld [vmem:[#allocation6 + $0x620] sm:$0xff]  ;;  %v284_v35 = vld [vmem:[#allocation6 + $0x630] sm:$0xff] }
  0x88   :  { %555 = vmatpush1.msra.mxu0 %v146_v36  ;;  %632 = vmatpush1.msra.mxu1 %v148_v37  ;;  %v275_v36 = vld [vmem:[#allocation6 + $0x5e8] sm:$0xff]  ;;  %v277_v37 = vld [vmem:[#allocation6 + $0x5f8] sm:$0xff] }
  0x89   :  { %556 = vmatprep.subr.mxu0 %v139_v38  ;;  %633 = vmatprep.subr.mxu1 %v141_v39  ;;  %v274_v38 = vld [vmem:[#allocation6 + $0x5e0] sm:$0xff]  ;;  %v276_v39 = vld [vmem:[#allocation6 + $0x5f0] sm:$0xff] }
  0x8a   :  { %557 = vmatpush1.msra.mxu0 %v138_v40  ;;  %634 = vmatpush1.msra.mxu1 %v140_v41  ;;  %v267_v40 = vld [vmem:[#allocation6 + $0x5a8] sm:$0xff]  ;;  %v269_v41 = vld [vmem:[#allocation6 + $0x5b8] sm:$0xff] }
  0x8b   :  { %558 = vmatprep.subr.mxu0 %v131_v42  ;;  %635 = vmatprep.subr.mxu1 %v133_v43  ;;  %v266_v42 = vld [vmem:[#allocation6 + $0x5a0] sm:$0xff]  ;;  %v268_v43 = vld [vmem:[#allocation6 + $0x5b0] sm:$0xff] }
  0x8c   :  { %559 = vmatpush1.msra.mxu0 %v130_v44  ;;  %636 = vmatpush1.msra.mxu1 %v132_v45  ;;  %v259_v44 = vld [vmem:[#allocation6 + $0x568] sm:$0xff]  ;;  %v261_v45 = vld [vmem:[#allocation6 + $0x578] sm:$0xff] }
  0x8d   :  { %560 = vmatprep.subr.mxu0 %v123_v46  ;;  %637 = vmatprep.subr.mxu1 %v125_v47  ;;  %v258_v46 = vld [vmem:[#allocation6 + $0x560] sm:$0xff]  ;;  %v260_v47 = vld [vmem:[#allocation6 + $0x570] sm:$0xff] }
  0x8e   :  { %561 = vmatpush1.msra.mxu0 %v122_v48  ;;  %638 = vmatpush1.msra.mxu1 %v124_v49  ;;  %v251_v48 = vld [vmem:[#allocation6 + $0x528] sm:$0xff]  ;;  %v253_v49 = vld [vmem:[#allocation6 + $0x538] sm:$0xff] }
  0x8f   :  { %562 = vmatprep.subr.mxu0 %v115_v50  ;;  %639 = vmatprep.subr.mxu1 %v117_v51  ;;  %v250_v50 = vld [vmem:[#allocation6 + $0x520] sm:$0xff]  ;;  %v252_v51 = vld [vmem:[#allocation6 + $0x530] sm:$0xff] }
  0x90   :  { %563 = vmatpush1.msra.mxu0 %v114_v52  ;;  %640 = vmatpush1.msra.mxu1 %v116_v53  ;;  %v243_v52 = vld [vmem:[#allocation6 + $0x4e8] sm:$0xff]  ;;  %v245_v53 = vld [vmem:[#allocation6 + $0x4f8] sm:$0xff] }
  0x91   :  { %564 = vmatprep.subr.mxu0 %v107_v54  ;;  %641 = vmatprep.subr.mxu1 %v109_v55  ;;  %v85_v54 = vld [vmem:[#allocation3 + $0x18] sm:$0xff]  ;;  %v242_v55 = vld [vmem:[#allocation6 + $0x4e0] sm:$0xff] }
  0x92   :  { %565 = vmatpush1.msra.mxu0 %v106_v56  ;;  %642 = vmatpush1.msra.mxu1 %v108_v57  ;;  %v244_v56 = vld [vmem:[#allocation6 + $0x4f0] sm:$0xff] }
  0x93   :  { %566 = vmatprep.subr.mxu0 %v99_v58  ;;  %643 = vmatprep.subr.mxu1 %v101_v59  ;;  %v84_v57 = vld [vmem:[#allocation3 + $0x10] sm:$0xff]  ;;  %v235_v58 = vld [vmem:[#allocation6 + $0x4a8] sm:$0xff]  ;;  %v237_v59 = vld [vmem:[#allocation6 + $0x4b8] sm:$0xff] }
  0x94   :  { %567 = vmatpush1.msra.mxu0 %v98_v60  ;;  %644 = vmatpush1.msra.mxu1 %v100_v61  ;;  %v234_v60 = vld [vmem:[#allocation6 + $0x4a0] sm:$0xff]  ;;  %v236_v61 = vld [vmem:[#allocation6 + $0x4b0] sm:$0xff] }
  0x95   :  { %568 = vmatprep.subr.mxu0 %v91_v62  ;;  %645 = vmatprep.subr.mxu1 %v93_v0  ;;  %v227_v62 = vld [vmem:[#allocation6 + $0x468] sm:$0xff]  ;;  %v229_v0 = vld [vmem:[#allocation6 + $0x478] sm:$0xff] }
  0x96   :  { %569 = vmatpush1.msra.mxu0 %v90_v2  ;;  %646 = vmatpush1.msra.mxu1 %v92_v3  ;;  %v226_v2 = vld [vmem:[#allocation6 + $0x460] sm:$0xff]  ;;  %v228_v3 = vld [vmem:[#allocation6 + $0x470] sm:$0xff] }
  0x97   :  { %570 = vmatprep.subr.mxu0 %v339_v4  ;;  %647 = vmatprep.subr.mxu1 %v341_v5  ;;  %v219_v4 = vld [vmem:[#allocation6 + $0x428] sm:$0xff]  ;;  %v221_v5 = vld [vmem:[#allocation6 + $0x438] sm:$0xff] }
  0x98   :  { %571 = vmatpush2.msra.mxu0 %v338_v6  ;;  %648 = vmatpush2.msra.mxu1 %v340_v7  ;;  %v218_v6 = vld [vmem:[#allocation6 + $0x420] sm:$0xff]  ;;  %v220_v7 = vld [vmem:[#allocation6 + $0x430] sm:$0xff] }
  0x99   :  { %572 = vmatprep.subr.mxu0 %v331_v8  ;;  %649 = vmatprep.subr.mxu1 %v333_v9  ;;  %v791_v8 = vld [vmem:[#allocation9 + $0xf8] sm:$0xff] }
  0x9a   :  { %573 = vmatpush2.msra.mxu0 %v330_v10  ;;  %650 = vmatpush2.msra.mxu1 %v332_v11  ;;  %v855_v9 = vld [vmem:[#allocation9 + $0x2f8] sm:$0xff]  ;;  %v790_v10 = vld [vmem:[#allocation9 + $0xf0] sm:$0xff] }
  0x9b   :  { %574 = vmatprep.subr.mxu0 %v323_v12  ;;  %651 = vmatprep.subr.mxu1 %v325_v13  ;;  %v854_v11 = vld [vmem:[#allocation9 + $0x2f0] sm:$0xff]  ;;  %v789_v12 = vld [vmem:[#allocation9 + $0xe8] sm:$0xff] }
  0x9c   :  { %575 = vmatpush2.msra.mxu0 %v322_v14  ;;  %652 = vmatpush2.msra.mxu1 %v324_v15  ;;  %v853_v13 = vld [vmem:[#allocation9 + $0x2e8] sm:$0xff]  ;;  %v788_v14 = vld [vmem:[#allocation9 + $0xe0] sm:$0xff] }
  0x9d   :  { %576 = vmatprep.subr.mxu0 %v315_v16  ;;  %653 = vmatprep.subr.mxu1 %v317_v17  ;;  %v852_v15 = vld [vmem:[#allocation9 + $0x2e0] sm:$0xff]  ;;  %v851_v16 = vld [vmem:[#allocation9 + $0x2d8] sm:$0xff]  ;;  %v786_v17 = vld [vmem:[#allocation9 + $0xd0] sm:$0xff] }
  0x9e   :  { %577 = vmatpush2.msra.mxu0 %v314_v18  ;;  %654 = vmatpush2.msra.mxu1 %v316_v19  ;;  %v785_v18 = vld [vmem:[#allocation9 + $0xc8] sm:$0xff] }
  0x9f   :  { %578 = vmatprep.subr.mxu0 %v307_v20  ;;  %655 = vmatprep.subr.mxu1 %v309_v21  ;;  %v849_v19 = vld [vmem:[#allocation9 + $0x2c8] sm:$0xff]  ;;  %v784_v20 = vld [vmem:[#allocation9 + $0xc0] sm:$0xff] }
  0xa0   :  { %579 = vmatpush2.msra.mxu0 %v306_v22  ;;  %656 = vmatpush2.msra.mxu1 %v308_v23  ;;  %v848_v21 = vld [vmem:[#allocation9 + $0x2c0] sm:$0xff]  ;;  %v783_v22 = vld [vmem:[#allocation9 + $0xb8] sm:$0xff] }
  0xa1   :  { %580 = vmatprep.subr.mxu0 %v299_v24  ;;  %657 = vmatprep.subr.mxu1 %v301_v25  ;;  %v847_v23 = vld [vmem:[#allocation9 + $0x2b8] sm:$0xff]  ;;  %v782_v24 = vld [vmem:[#allocation9 + $0xb0] sm:$0xff] }
  0xa2   :  { %581 = vmatpush2.msra.mxu0 %v298_v26  ;;  %658 = vmatpush2.msra.mxu1 %v300_v27  ;;  %v846_v25 = vld [vmem:[#allocation9 + $0x2b0] sm:$0xff]  ;;  %v781_v26 = vld [vmem:[#allocation9 + $0xa8] sm:$0xff] }
  0xa3   :  { %582 = vmatprep.subr.mxu0 %v291_v28  ;;  %659 = vmatprep.subr.mxu1 %v293_v29  ;;  %v845_v27 = vld [vmem:[#allocation9 + $0x2a8] sm:$0xff]  ;;  %v780_v28 = vld [vmem:[#allocation9 + $0xa0] sm:$0xff] }
  0xa4   :  { %583 = vmatpush2.msra.mxu0 %v290_v30  ;;  %660 = vmatpush2.msra.mxu1 %v292_v31  ;;  %v844_v29 = vld [vmem:[#allocation9 + $0x2a0] sm:$0xff]  ;;  %v779_v30 = vld [vmem:[#allocation9 + $0x98] sm:$0xff] }
  0xa5   :  { %584 = vmatprep.subr.mxu0 %v283_v32  ;;  %661 = vmatprep.subr.mxu1 %v285_v33  ;;  %v843_v31 = vld [vmem:[#allocation9 + $0x298] sm:$0xff]  ;;  %v778_v32 = vld [vmem:[#allocation9 + $0x90] sm:$0xff] }
  0xa6   :  { %585 = vmatpush2.msra.mxu0 %v282_v34  ;;  %662 = vmatpush2.msra.mxu1 %v284_v35  ;;  %v842_v33 = vld [vmem:[#allocation9 + $0x290] sm:$0xff]  ;;  %v777_v34 = vld [vmem:[#allocation9 + $0x88] sm:$0xff] }
  0xa7   :  { %586 = vmatprep.subr.mxu0 %v275_v36  ;;  %663 = vmatprep.subr.mxu1 %v277_v37  ;;  %v841_v35 = vld [vmem:[#allocation9 + $0x288] sm:$0xff]  ;;  %v776_v36 = vld [vmem:[#allocation9 + $0x80] sm:$0xff] }
  0xa8   :  { %587 = vmatpush2.msra.mxu0 %v274_v38  ;;  %664 = vmatpush2.msra.mxu1 %v276_v39  ;;  %v840_v37 = vld [vmem:[#allocation9 + $0x280] sm:$0xff]  ;;  %v775_v38 = vld [vmem:[#allocation9 + $0x78] sm:$0xff] }
  0xa9   :  { %588 = vmatprep.subr.mxu0 %v267_v40  ;;  %665 = vmatprep.subr.mxu1 %v269_v41  ;;  %v839_v39 = vld [vmem:[#allocation9 + $0x278] sm:$0xff]  ;;  %v774_v40 = vld [vmem:[#allocation9 + $0x70] sm:$0xff] }
  0xaa   :  { %589 = vmatpush2.msra.mxu0 %v266_v42  ;;  %666 = vmatpush2.msra.mxu1 %v268_v43  ;;  %v838_v41 = vld [vmem:[#allocation9 + $0x270] sm:$0xff]  ;;  %v773_v42 = vld [vmem:[#allocation9 + $0x68] sm:$0xff] }
  0xab   :  { %590 = vmatprep.subr.mxu0 %v259_v44  ;;  %667 = vmatprep.subr.mxu1 %v261_v45  ;;  %v837_v43 = vld [vmem:[#allocation9 + $0x268] sm:$0xff]  ;;  %v772_v44 = vld [vmem:[#allocation9 + $0x60] sm:$0xff] }
  0xac   :  { %591 = vmatpush2.msra.mxu0 %v258_v46  ;;  %668 = vmatpush2.msra.mxu1 %v260_v47  ;;  %v836_v45 = vld [vmem:[#allocation9 + $0x260] sm:$0xff]  ;;  %v771_v46 = vld [vmem:[#allocation9 + $0x58] sm:$0xff] }
  0xad   :  { %592 = vmatprep.subr.mxu0 %v251_v48  ;;  %669 = vmatprep.subr.mxu1 %v253_v49  ;;  %v835_v47 = vld [vmem:[#allocation9 + $0x258] sm:$0xff]  ;;  %v770_v48 = vld [vmem:[#allocation9 + $0x50] sm:$0xff] }
  0xae   :  { %593 = vmatpush2.msra.mxu0 %v250_v50  ;;  %670 = vmatpush2.msra.mxu1 %v252_v51  ;;  %v834_v49 = vld [vmem:[#allocation9 + $0x250] sm:$0xff]  ;;  %v769_v50 = vld [vmem:[#allocation9 + $0x48] sm:$0xff] }
  0xaf   :  { %594 = vmatprep.subr.mxu0 %v243_v52  ;;  %671 = vmatprep.subr.mxu1 %v245_v53  ;;  %v833_v51 = vld [vmem:[#allocation9 + $0x248] sm:$0xff]  ;;  %v768_v52 = vld [vmem:[#allocation9 + $0x40] sm:$0xff] }
  0xb0   :  { %454 = vmatprep.mubr.f32.mxu0 %v85_v54  ;;  %531 = vmatprep.mubr.f32.mxu1 %v85_v54  ;;  %v832_v53 = vld [vmem:[#allocation9 + $0x240] sm:$0xff] }
  0xb1   :  { %595 = vmatpush2.msra.mxu0 %v242_v55  ;;  %672 = vmatpush2.msra.mxu1 %v244_v56  ;;  %v831_v55 = vld [vmem:[#allocation9 + $0x238] sm:$0xff]  ;;  %v766_v56 = vld [vmem:[#allocation9 + $0x30] sm:$0xff] }
  0xb2   :  { %455 = vmatmul.mubr.f32.gmra.mxu0 %v84_v57  ;;  %532 = vmatmul.mubr.f32.gmra.mxu1 %v84_v57 }
  0xb3   :  { %596 = vmatprep.subr.mxu0 %v235_v58  ;;  %673 = vmatprep.subr.mxu1 %v237_v59  ;;  %v765_v58 = vld [vmem:[#allocation9 + $0x28] sm:$0xff] }
  0xb4   :  { %597 = vmatpush2.msra.mxu0 %v234_v60  ;;  %674 = vmatpush2.msra.mxu1 %v236_v61  ;;  %v829_v59 = vld [vmem:[#allocation9 + $0x228] sm:$0xff]  ;;  %v764_v60 = vld [vmem:[#allocation9 + $0x20] sm:$0xff] }
  0xb5   :  { %598 = vmatprep.subr.mxu0 %v227_v62  ;;  %675 = vmatprep.subr.mxu1 %v229_v0  ;;  %v828_v61 = vld [vmem:[#allocation9 + $0x220] sm:$0xff]  ;;  %v763_v62 = vld [vmem:[#allocation9 + $0x18] sm:$0xff] }
  0xb6   :  { %599 = vmatpush2.msra.mxu0 %v226_v2  ;;  %676 = vmatpush2.msra.mxu1 %v228_v3  ;;  %v827_v0 = vld [vmem:[#allocation9 + $0x218] sm:$0xff]  ;;  %v762_v2 = vld [vmem:[#allocation9 + $0x10] sm:$0xff] }
  0xb7   :  { %600 = vmatprep.subr.mxu0 %v219_v4  ;;  %677 = vmatprep.subr.mxu1 %v221_v5  ;;  %v826_v3 = vld [vmem:[#allocation9 + $0x210] sm:$0xff]  ;;  %v761_v4 = vld [vmem:[#allocation9 + $0x8] sm:$0xff] }
  0xb8   :  { %601 = vmatpush2.msra.mxu0 %v218_v6  ;;  %602 = vmatprep.mubr.f32.mxu0 %v1310_v63  ;;  %v825_v5 = vld [vmem:[#allocation9 + $0x208] sm:$0xff]  ;;  %v760_v6 = vld [vmem:[#allocation9] sm:$0xff] }
  0xb9   :  { %678 = vmatpush2.msra.mxu1 %v220_v7  ;;  %679 = vmatprep.mubr.f32.mxu1 %v1310_v63  ;;  %v787_v63 = vld [vmem:[#allocation9 + $0xd8] sm:$0xff]  ;;  %v824_v7 = vld [vmem:[#allocation9 + $0x200] sm:$0xff] }
  0xba   :  { %603 = vmatmul.mubr.f32.vlgmr.msra.gmra.mxu0 %v1312_v1  ;;  %680 = vmatmul.mubr.f32.vlgmr.msra.gmra.mxu1 %v1312_v1  ;;  %v850_v1 = vld [vmem:[#allocation9 + $0x2d0] sm:$0xff] }
  0xbb   :  { %608 = vmatprep.mubr.f32.mxu0 %v85_v54  ;;  %685 = vmatprep.mubr.f32.mxu1 %v85_v54  ;;  %v767_v54 = vld [vmem:[#allocation9 + $0x38] sm:$0xff] }
  0xbc   :  { %888 = vmatprep.subr.mxu0 %v791_v8  ;;  %965 = vmatprep.subr.mxu1 %v855_v9  ;;  %v823_v8 = vld [vmem:[#allocation9 + $0x1f8] sm:$0xff] }
  0xbd   :  { %889 = vmatpush1.msra.mxu0 %v790_v10  ;;  %966 = vmatpush1.msra.mxu1 %v854_v11  ;;  %v887_v9 = vld [vmem:[#allocation9 + $0x3f8] sm:$0xff]  ;;  %v822_v10 = vld [vmem:[#allocation9 + $0x1f0] sm:$0xff] }
  0xbe   :  { %609 = vmatmul.mubr.f32.gmra.mxu0 %v84_v57  ;;  %686 = vmatmul.mubr.f32.gmra.mxu1 %v84_v57  ;;  %v830_v57 = vld [vmem:[#allocation9 + $0x230] sm:$0xff] }
  0xbf   :  { %890 = vmatprep.subr.mxu0 %v789_v12  ;;  %967 = vmatprep.subr.mxu1 %v853_v13  ;;  %v886_v11 = vld [vmem:[#allocation9 + $0x3f0] sm:$0xff]  ;;  %v821_v12 = vld [vmem:[#allocation9 + $0x1e8] sm:$0xff] }
  0xc0   :  { %891 = vmatpush1.msra.mxu0 %v788_v14  ;;  %968 = vmatpush1.msra.mxu1 %v852_v15  ;;  %v885_v13 = vld [vmem:[#allocation9 + $0x3e8] sm:$0xff]  ;;  %v820_v14 = vld [vmem:[#allocation9 + $0x1e0] sm:$0xff] }
  0xc1   :  { %892 = vmatprep.subr.mxu0 %v787_v63  ;;  %969 = vmatprep.subr.mxu1 %v851_v16  ;;  %v884_v15 = vld [vmem:[#allocation9 + $0x3e0] sm:$0xff]  ;;  %v819_v63 = vld [vmem:[#allocation9 + $0x1d8] sm:$0xff] }
  0xc2   :  { %893 = vmatpush1.msra.mxu0 %v786_v17  ;;  %970 = vmatpush1.msra.mxu1 %v850_v1  ;;  %v883_v16 = vld [vmem:[#allocation9 + $0x3d8] sm:$0xff]  ;;  %v818_v17 = vld [vmem:[#allocation9 + $0x1d0] sm:$0xff] }
  0xc3   :  { %894 = vmatprep.subr.mxu0 %v785_v18  ;;  %971 = vmatprep.subr.mxu1 %v849_v19  ;;  %v882_v1 = vld [vmem:[#allocation9 + $0x3d0] sm:$0xff]  ;;  %v817_v18 = vld [vmem:[#allocation9 + $0x1c8] sm:$0xff] }
  0xc4   :  { %895 = vmatpush1.msra.mxu0 %v784_v20  ;;  %972 = vmatpush1.msra.mxu1 %v848_v21  ;;  %v881_v19 = vld [vmem:[#allocation9 + $0x3c8] sm:$0xff]  ;;  %v816_v20 = vld [vmem:[#allocation9 + $0x1c0] sm:$0xff] }
  0xc5   :  { %896 = vmatprep.subr.mxu0 %v783_v22  ;;  %973 = vmatprep.subr.mxu1 %v847_v23  ;;  %v880_v21 = vld [vmem:[#allocation9 + $0x3c0] sm:$0xff]  ;;  %v815_v22 = vld [vmem:[#allocation9 + $0x1b8] sm:$0xff] }
  0xc6   :  { %897 = vmatpush1.msra.mxu0 %v782_v24  ;;  %974 = vmatpush1.msra.mxu1 %v846_v25  ;;  %v879_v23 = vld [vmem:[#allocation9 + $0x3b8] sm:$0xff]  ;;  %v814_v24 = vld [vmem:[#allocation9 + $0x1b0] sm:$0xff] }
  0xc7   :  { %898 = vmatprep.subr.mxu0 %v781_v26  ;;  %975 = vmatprep.subr.mxu1 %v845_v27  ;;  %v878_v25 = vld [vmem:[#allocation9 + $0x3b0] sm:$0xff]  ;;  %v813_v26 = vld [vmem:[#allocation9 + $0x1a8] sm:$0xff] }
  0xc8   :  { %899 = vmatpush1.msra.mxu0 %v780_v28  ;;  %976 = vmatpush1.msra.mxu1 %v844_v29  ;;  %v877_v27 = vld [vmem:[#allocation9 + $0x3a8] sm:$0xff]  ;;  %v812_v28 = vld [vmem:[#allocation9 + $0x1a0] sm:$0xff] }
  0xc9   :  { %900 = vmatprep.subr.mxu0 %v779_v30  ;;  %977 = vmatprep.subr.mxu1 %v843_v31  ;;  %v876_v29 = vld [vmem:[#allocation9 + $0x3a0] sm:$0xff]  ;;  %v811_v30 = vld [vmem:[#allocation9 + $0x198] sm:$0xff] }
  0xca   :  { %901 = vmatpush1.msra.mxu0 %v778_v32  ;;  %978 = vmatpush1.msra.mxu1 %v842_v33  ;;  %v875_v31 = vld [vmem:[#allocation9 + $0x398] sm:$0xff]  ;;  %v810_v32 = vld [vmem:[#allocation9 + $0x190] sm:$0xff] }
  0xcb   :  { %902 = vmatprep.subr.mxu0 %v777_v34  ;;  %979 = vmatprep.subr.mxu1 %v841_v35  ;;  %v874_v33 = vld [vmem:[#allocation9 + $0x390] sm:$0xff]  ;;  %v809_v34 = vld [vmem:[#allocation9 + $0x188] sm:$0xff] }
  0xcc   :  { %903 = vmatpush1.msra.mxu0 %v776_v36  ;;  %980 = vmatpush1.msra.mxu1 %v840_v37  ;;  %v873_v35 = vld [vmem:[#allocation9 + $0x388] sm:$0xff]  ;;  %v808_v36 = vld [vmem:[#allocation9 + $0x180] sm:$0xff] }
  0xcd   :  { %904 = vmatprep.subr.mxu0 %v775_v38  ;;  %981 = vmatprep.subr.mxu1 %v839_v39  ;;  %v872_v37 = vld [vmem:[#allocation9 + $0x380] sm:$0xff]  ;;  %v807_v38 = vld [vmem:[#allocation9 + $0x178] sm:$0xff] }
  0xce   :  { %905 = vmatpush1.msra.mxu0 %v774_v40  ;;  %982 = vmatpush1.msra.mxu1 %v838_v41  ;;  %v871_v39 = vld [vmem:[#allocation9 + $0x378] sm:$0xff]  ;;  %v806_v40 = vld [vmem:[#allocation9 + $0x170] sm:$0xff] }
  0xcf   :  { %906 = vmatprep.subr.mxu0 %v773_v42  ;;  %983 = vmatprep.subr.mxu1 %v837_v43  ;;  %v870_v41 = vld [vmem:[#allocation9 + $0x370] sm:$0xff]  ;;  %v805_v42 = vld [vmem:[#allocation9 + $0x168] sm:$0xff] }
  0xd0   :  { %907 = vmatpush1.msra.mxu0 %v772_v44  ;;  %984 = vmatpush1.msra.mxu1 %v836_v45  ;;  %v869_v43 = vld [vmem:[#allocation9 + $0x368] sm:$0xff]  ;;  %v804_v44 = vld [vmem:[#allocation9 + $0x160] sm:$0xff] }
  0xd1   :  { %908 = vmatprep.subr.mxu0 %v771_v46  ;;  %985 = vmatprep.subr.mxu1 %v835_v47  ;;  %v868_v45 = vld [vmem:[#allocation9 + $0x360] sm:$0xff]  ;;  %v803_v46 = vld [vmem:[#allocation9 + $0x158] sm:$0xff] }
  0xd2   :  { %909 = vmatpush1.msra.mxu0 %v770_v48  ;;  %986 = vmatpush1.msra.mxu1 %v834_v49  ;;  %v867_v47 = vld [vmem:[#allocation9 + $0x358] sm:$0xff]  ;;  %v802_v48 = vld [vmem:[#allocation9 + $0x150] sm:$0xff] }
  0xd3   :  { %910 = vmatprep.subr.mxu0 %v769_v50  ;;  %987 = vmatprep.subr.mxu1 %v833_v51  ;;  %v866_v49 = vld [vmem:[#allocation9 + $0x350] sm:$0xff]  ;;  %v801_v50 = vld [vmem:[#allocation9 + $0x148] sm:$0xff] }
  0xd4   :  { %911 = vmatpush1.msra.mxu0 %v768_v52  ;;  %988 = vmatpush1.msra.mxu1 %v832_v53  ;;  %v865_v51 = vld [vmem:[#allocation9 + $0x348] sm:$0xff]  ;;  %v800_v52 = vld [vmem:[#allocation9 + $0x140] sm:$0xff] }
  0xd5   :  { %912 = vmatprep.subr.mxu0 %v767_v54  ;;  %989 = vmatprep.subr.mxu1 %v831_v55  ;;  %v864_v53 = vld [vmem:[#allocation9 + $0x340] sm:$0xff]  ;;  %v799_v54 = vld [vmem:[#allocation9 + $0x138] sm:$0xff] }
  0xd6   :  { %913 = vmatpush1.msra.mxu0 %v766_v56  ;;  %990 = vmatpush1.msra.mxu1 %v830_v57  ;;  %v863_v55 = vld [vmem:[#allocation9 + $0x338] sm:$0xff]  ;;  %v798_v56 = vld [vmem:[#allocation9 + $0x130] sm:$0xff] }
  0xd7   :  { %914 = vmatprep.subr.mxu0 %v765_v58  ;;  %991 = vmatprep.subr.mxu1 %v829_v59  ;;  %v862_v57 = vld [vmem:[#allocation9 + $0x330] sm:$0xff]  ;;  %v797_v58 = vld [vmem:[#allocation9 + $0x128] sm:$0xff] }
  0xd8   :  { %915 = vmatpush1.msra.mxu0 %v764_v60  ;;  %992 = vmatpush1.msra.mxu1 %v828_v61  ;;  %v861_v59 = vld [vmem:[#allocation9 + $0x328] sm:$0xff]  ;;  %v796_v60 = vld [vmem:[#allocation9 + $0x120] sm:$0xff] }
  0xd9   :  { %916 = vmatprep.subr.mxu0 %v763_v62  ;;  %993 = vmatprep.subr.mxu1 %v827_v0  ;;  %v860_v61 = vld [vmem:[#allocation9 + $0x320] sm:$0xff]  ;;  %v795_v62 = vld [vmem:[#allocation9 + $0x118] sm:$0xff] }
  0xda   :  { %917 = vmatpush1.msra.mxu0 %v762_v2  ;;  %994 = vmatpush1.msra.mxu1 %v826_v3  ;;  %v859_v0 = vld [vmem:[#allocation9 + $0x318] sm:$0xff]  ;;  %v794_v2 = vld [vmem:[#allocation9 + $0x110] sm:$0xff] }
  0xdb   :  { %918 = vmatprep.subr.mxu0 %v761_v4  ;;  %995 = vmatprep.subr.mxu1 %v825_v5  ;;  %v858_v3 = vld [vmem:[#allocation9 + $0x310] sm:$0xff]  ;;  %v793_v4 = vld [vmem:[#allocation9 + $0x108] sm:$0xff] }
  0xdc   :  { %919 = vmatpush1.msra.mxu0 %v760_v6  ;;  %996 = vmatpush1.msra.mxu1 %v824_v7  ;;  %v857_v5 = vld [vmem:[#allocation9 + $0x308] sm:$0xff]  ;;  %v792_v6 = vld [vmem:[#allocation9 + $0x100] sm:$0xff] }
  0xdd   :  { %920 = vmatprep.subr.mxu0 %v823_v8  ;;  %997 = vmatprep.subr.mxu1 %v887_v9  ;;  %v856_v7 = vld [vmem:[#allocation9 + $0x300] sm:$0xff]  ;;  %v344_v8 = vlaneseq }
  0xde   :  { %921 = vmatpush2.msra.mxu0 %v822_v10  ;;  %998 = vmatpush2.msra.mxu1 %v886_v11 }
  0xdf   :  { %922 = vmatprep.subr.mxu0 %v821_v12  ;;  %999 = vmatprep.subr.mxu1 %v885_v13  ;;  %v1326_v11 = vshrl.u32 %v344_v8, 7 }
  0xe0   :  { %923 = vmatpush2.msra.mxu0 %v820_v14  ;;  %1000 = vmatpush2.msra.mxu1 %v884_v15 }
  0xe1   :  { %924 = vmatprep.subr.mxu0 %v819_v63  ;;  %1001 = vmatprep.subr.mxu1 %v883_v16  ;;  %v362_v14 = vsub.s32 4, %v1326_v11  ;;  %v370_v15 = vsub.s32 6, %v1326_v11 }
  0xe2   :  { %925 = vmatpush2.msra.mxu0 %v818_v17  ;;  %1002 = vmatpush2.msra.mxu1 %v882_v1  ;;  %v366_v17 = vsub.s32 5, %v1326_v11  ;;  %v374_v1 = vsub.s32 7, %v1326_v11 }
  0xe3   :  { %926 = vmatprep.subr.mxu0 %v817_v18  ;;  %1003 = vmatprep.subr.mxu1 %v881_v19  ;;  %v1340_v18 = vld [vmem:[#allocation8] sm:$0xff] }
  0xe4   :  { %927 = vmatpush2.msra.mxu0 %v816_v20  ;;  %1004 = vmatpush2.msra.mxu1 %v880_v21  ;;  %v363_v19 = vrot.slane %v1340_v18, %v362_v14  ;;  %v371_v20 = vrot.slane %v1340_v18, %v370_v15 }
  0xe5   :  { %928 = vmatprep.subr.mxu0 %v815_v22  ;;  %1005 = vmatprep.subr.mxu1 %v879_v23  ;;  %v367_v23 = vrot.slane %v1340_v18, %v366_v17 }
  0xe6   :  { %929 = vmatpush2.msra.mxu0 %v814_v24  ;;  %1006 = vmatpush2.msra.mxu1 %v878_v25  ;;  %v375_v24 = vrot.slane %v1340_v18, %v374_v1 }
  0xe7   :  { %930 = vmatprep.subr.mxu0 %v813_v26  ;;  %1007 = vmatprep.subr.mxu1 %v877_v27 }
  0xe8   :  { %931 = vmatpush2.msra.mxu0 %v812_v28  ;;  %1008 = vmatpush2.msra.mxu1 %v876_v29 }
  0xe9   :  { %932 = vmatprep.subr.mxu0 %v811_v30  ;;  %1009 = vmatprep.subr.mxu1 %v875_v31 }
  0xea   :  { %933 = vmatpush2.msra.mxu0 %v810_v32  ;;  %1010 = vmatpush2.msra.mxu1 %v874_v33 }
  0xeb   :  { %934 = vmatprep.subr.mxu0 %v809_v34  ;;  %1011 = vmatprep.subr.mxu1 %v873_v35 }
  0xec   :  { %935 = vmatpush2.msra.mxu0 %v808_v36  ;;  %1012 = vmatpush2.msra.mxu1 %v872_v37 }
  0xed   :  { %936 = vmatprep.subr.mxu0 %v807_v38  ;;  %1013 = vmatprep.subr.mxu1 %v871_v39 }
  0xee   :  { %937 = vmatpush2.msra.mxu0 %v806_v40  ;;  %1014 = vmatpush2.msra.mxu1 %v870_v41 }
  0xef   :  { %938 = vmatprep.subr.mxu0 %v805_v42  ;;  %1015 = vmatprep.subr.mxu1 %v869_v43 }
  0xf0   :  { %939 = vmatpush2.msra.mxu0 %v804_v44  ;;  %1016 = vmatpush2.msra.mxu1 %v868_v45 }
  0xf1   :  { %940 = vmatprep.subr.mxu0 %v803_v46  ;;  %1017 = vmatprep.subr.mxu1 %v867_v47 }
  0xf2   :  { %941 = vmatpush2.msra.mxu0 %v802_v48  ;;  %1018 = vmatpush2.msra.mxu1 %v866_v49 }
  0xf3   :  { %942 = vmatprep.subr.mxu0 %v801_v50  ;;  %1019 = vmatprep.subr.mxu1 %v865_v51 }
  0xf4   :  { %943 = vmatpush2.msra.mxu0 %v800_v52  ;;  %1020 = vmatpush2.msra.mxu1 %v864_v53 }
  0xf5   :  { %944 = vmatprep.subr.mxu0 %v799_v54  ;;  %1021 = vmatprep.subr.mxu1 %v863_v55 }
  0xf6   :  { %945 = vmatpush2.msra.mxu0 %v798_v56  ;;  %1022 = vmatpush2.msra.mxu1 %v862_v57 }
  0xf7   :  { %946 = vmatprep.subr.mxu0 %v797_v58  ;;  %1023 = vmatprep.subr.mxu1 %v861_v59 }
  0xf8   :  { %947 = vmatpush2.msra.mxu0 %v796_v60  ;;  %1024 = vmatpush2.msra.mxu1 %v860_v61 }
  0xf9   :  { %948 = vmatprep.subr.mxu0 %v795_v62  ;;  %1025 = vmatprep.subr.mxu1 %v859_v0 }
  0xfa   :  { %949 = vmatpush2.msra.mxu0 %v794_v2  ;;  %1026 = vmatpush2.msra.mxu1 %v858_v3  ;;  %v350_v3 = vsub.s32 1, %v1326_v11 }
  0xfb   :  { %950 = vmatprep.subr.mxu0 %v793_v4  ;;  %1027 = vmatprep.subr.mxu1 %v857_v5  ;;  %v346_v4 = vsub.s32 0, %v1326_v11  ;;  %v358_v5 = vsub.s32 3, %v1326_v11 }
  0xfc   :  { %951 = vmatpush2.msra.mxu0 %v792_v6  ;;  %1028 = vmatpush2.msra.mxu1 %v856_v7  ;;  %v354_v6 = vsub.s32 2, %v1326_v11  ;;  %v351_v7 = vrot.slane %v1340_v18, %v350_v3 }
  0xfd   :  { %v347_v14 = vrot.slane %v1340_v18, %v346_v4  ;;  %v359_v15 = vrot.slane %v1340_v18, %v358_v5 }
  0xfe   :  { %v355_v1 = vrot.slane %v1340_v18, %v354_v6 }
 0x136   :  { %v1322_v9 = vpop.f32.mrf.mxu0  ;;  %v1324_v10 = vpop.f32.mrf.mxu1 }
 0x137   :  { %v528_v18 = vadd.f32 %v1324_v10, %v355_v1 }
 0x138   :  { %v1328_v12 = vpop.f32.mrf.mxu0  ;;  %v1330_v13 = vpop.f32.mrf.mxu1 }
 0x172   :  { %v1334_v63 = vpop.f32.mrf.mxu0  ;;  %v1336_v16 = vpop.f32.mrf.mxu1 }
 0x174   :  { %v1344_v21 = vpop.f32.mrf.mxu0  ;;  %v1346_v22 = vpop.f32.mrf.mxu1 }
 0x17a   :  { %v604_v25 = vpop.f32.mrf.mxu0  ;;  %v681_v26 = vpop.f32.mrf.mxu1 }
 0x17b   :  { %v1350_v27 = vadd.f32 %v604_v25, %v363_v19  ;;  %v1352_v28 = vadd.f32 %v681_v26, %v371_v20 }
 0x17c   :  { %v606_v29 = vpop.f32.mrf.mxu0  ;;  %v683_v30 = vpop.f32.mrf.mxu1 }
 0x17d   :  { %v1096_v31 = vmul.f32 -1.442695, %v1350_v27  ;;  %v1098_v32 = vmul.f32 -1.442695, %v1352_v28  ;;  %v1356_v33 = vadd.f32 %v606_v29, %v367_v23  ;;  %v1358_v34 = vadd.f32 %v683_v30, %v375_v24 }
 0x17e   :  { %v610_v35 = vpop.f32.mrf.mxu0  ;;  %v687_v36 = vpop.f32.mrf.mxu1  ;;  %v451_v29 = vadd.f32 %v1322_v9, %v347_v14  ;;  %v530_v30 = vadd.f32 %v1330_v13, %v359_v15  ;;  %v457_v13 = vadd.f32 %v1334_v63, %v347_v14  ;;  %v1057_v63 = vld [vmem:[%s1411_s4] sm:$0x3]  ;;  %s1225_s4 = scalar_lea.vmem %s1083_s16, 512 }
 0x17f   :  { %1113 = vpow2.f32 %v1096_v31  ;;  %v1097_v37 = vmul.f32 -1.442695, %v1356_v33  ;;  %v1099_v38 = vmul.f32 -1.442695, %v1358_v34  ;;  %v1362_v39 = vadd.f32 %v610_v35, %v363_v19  ;;  %p1226_p6 = scmp.ne.s32.totalorder %s1083_s16, %s1225_s4  ;;  %p1231_p8 = scmp.lt.s32.totalorder %s1225_s4, %s1225_s4 }
 0x180   :  { %1115 = vpow2.f32 %v1098_v32  ;;  %v1364_v40 = vadd.f32 %v687_v36, %v371_v20  ;;  %v612_v41 = vpop.f32.mrf.mxu0  ;;  %v689_v42 = vpop.f32.mrf.mxu1 }
 0x181   :  { %1117 = vpow2.f32 %v1097_v37  ;;  %v1100_v43 = vmul.f32 -1.442695, %v1362_v39  ;;  %v1367_v44 = vadd.f32 %v612_v41, %v367_v23  ;;  %v1369_v45 = vadd.f32 %v689_v42, %v375_v24  ;;  %p1232_p9 = por %p1231_p8, %p1230_p7 }
 0x182   :  { %1119 = vpow2.f32 %v1099_v38  ;;  %v1102_v46 = vmul.f32 -1.442695, %v1364_v40  ;;  %v453_v24 = vadd.f32 %v1328_v12, %v351_v7 }
 0x183   :  { %1121 = vpow2.f32 %v1100_v43  ;;  %v1101_v47 = vmul.f32 -1.442695, %v1367_v44  ;;  %v1103_v48 = vmul.f32 -1.442695, %v1369_v45  ;;  %p1233_p10 = pnand %p1232_p9, %p1226_p6 }
 0x184   :  { %1123 = vpow2.f32 %v1102_v46 }
 0x185   :  { %1125 = vpow2.f32 %v1101_v47 }
 0x186   :  { %1127 = vpow2.f32 %v1103_v48  ;;  %v1066_v48 = vrot.slane %v1057_v63, %v350_v3 }
 0x18c   :  { %v1114_v49 = vpop.eup %1113 }
 0x18d   :  { %v1116_v50 = vpop.eup %1115  ;;  %v716_v51 = vadd.f32 1.0, %v1114_v49 }
 0x18e   :  { %v1118_v52 = vpop.eup %1117  ;;  %v718_v53 = vadd.f32 1.0, %v1116_v50 }
 0x18f   :  { %v1120_v54 = vpop.eup %1119  ;;  %1129 = vrcp.f32 %v716_v51  ;;  %v717_v55 = vadd.f32 1.0, %v1118_v52 }
 0x190   :  { %v1122_v56 = vpop.eup %1121  ;;  %1131 = vrcp.f32 %v718_v53  ;;  %v719_v57 = vadd.f32 1.0, %v1120_v54 }
 0x191   :  { %v1124_v58 = vpop.eup %1123  ;;  %1133 = vrcp.f32 %v717_v55  ;;  %v720_v59 = vadd.f32 1.0, %v1122_v56 }
 0x192   :  { %v1126_v60 = vpop.eup %1125  ;;  %1135 = vrcp.f32 %v719_v57  ;;  %v722_v61 = vadd.f32 1.0, %v1124_v58 }
 0x193   :  { %v1128_v62 = vpop.eup %1127  ;;  %1137 = vrcp.f32 %v720_v59  ;;  %v721_v0 = vadd.f32 1.0, %v1126_v60 }
 0x194   :  { %1139 = vrcp.f32 %v722_v61  ;;  %v723_v2 = vadd.f32 1.0, %v1128_v62 }
 0x195   :  { %1141 = vrcp.f32 %v721_v0 }
 0x196   :  { %1143 = vrcp.f32 %v723_v2 }
 0x19c   :  { %v1130_v8 = vpop.eup %1129 }
 0x19d   :  { %v1132_v17 = vpop.eup %1131  ;;  %v740_v20 = vmul.f32 %v1130_v8, %v1350_v27 }
 0x19e   :  { %v1134_v19 = vpop.eup %1133  ;;  %v742_v25 = vmul.f32 %v1132_v17, %v1352_v28  ;;  %v459_v28 = vadd.f32 %v1344_v21, %v351_v7 }
 0x19f   :  { %v1136_v23 = vpop.eup %1135  ;;  %v741_v11 = vmul.f32 %v1134_v19, %v1356_v33  ;;  %v748_v27 = vmul.f32 %v740_v20, %v451_v29 }
 0x1a0   :  { %v1138_v26 = vpop.eup %1137  ;;  %v743_v31 = vmul.f32 %v1136_v23, %v1358_v34  ;;  %v750_v33 = vmul.f32 %v742_v25, %v528_v18  ;;  %v536_v34 = vadd.f32 %v1346_v22, %v359_v15 }
 0x1a1   :  { %v1140_v32 = vpop.eup %1139  ;;  %v749_v35 = vmul.f32 %v741_v11, %v453_v24  ;;  %v744_v37 = vmul.f32 %v1138_v26, %v1362_v39  ;;  %v534_v39 = vadd.f32 %v1336_v16, %v355_v1 }
 0x1a2   :  { %v1142_v36 = vpop.eup %1141  ;;  %v751_v12 = vmul.f32 %v743_v31, %v530_v30  ;;  %v746_v41 = vmul.f32 %v1140_v32, %v1364_v40  ;;  %v1062_v40 = vrot.slane %v1057_v63, %v346_v4 }
 0x1a3   :  { %v1144_v38 = vpop.eup %1143  ;;  %v745_v9 = vmul.f32 %v1142_v36, %v1367_v44  ;;  %952 = vmatprep.mubr.f32.mxu0 %v749_v35  ;;  %v752_v21 = vmul.f32 %v744_v37, %v457_v13 }
 0x1a4   :  { %v747_v10 = vmul.f32 %v1144_v38, %v1369_v45  ;;  %1029 = vmatprep.mubr.f32.mxu1 %v751_v12  ;;  %953 = vmatmul.mubr.f32.vlgmr.msra.gmra.mxu0 %v748_v27  ;;  %v754_v46 = vmul.f32 %v746_v41, %v534_v39 }
 0x1a5   :  { %1030 = vmatmul.mubr.f32.vlgmr.msra.gmra.mxu1 %v750_v33  ;;  %v753_v42 = vmul.f32 %v745_v9, %v459_v28 }
 0x1a6   :  { %v755_v43 = vmul.f32 %v747_v10, %v536_v34 }
 0x1a7   :  { %958 = vmatprep.mubr.f32.mxu0 %v753_v42 }
 0x1a8   :  { %1035 = vmatprep.mubr.f32.mxu1 %v755_v43  ;;  %959 = vmatmul.mubr.f32.gmra.mxu0 %v752_v21 }
 0x1a9   :  { %1036 = vmatmul.mubr.f32.gmra.mxu1 %v754_v46 }
 0x264   :  { %v954_v22 = vpop.f32.mrf.mxu0 }
 0x265   :  { %v1031_v44 = vpop.f32.mrf.mxu1 }
 0x266   :  { %v1032_v45 = vadd.f32 %v1031_v44, %v954_v22  ;;  %v956_v47 = vpop.f32.mrf.mxu0 }
 0x267   :  { %v1033_v16 = vpop.f32.mrf.mxu1 }
 0x268   :  { %v1069_v49 = vadd.f32 %v1062_v40, %v1032_v45  ;;  %v1034_v50 = vadd.f32 %v1033_v16, %v956_v47  ;;  %v960_v51 = vpop.f32.mrf.mxu0 }
 0x269   :  { %v1037_v52 = vpop.f32.mrf.mxu1 }
 0x26a   :  { %1073 = vst [vmem:[#allocation11] sm:$0xff] %v1069_v49  ;;  %v1070_v53 = vadd.f32 %v1066_v48, %v1034_v50  ;;  %v1038_v54 = vadd.f32 %v1037_v52, %v960_v51  ;;  %v962_v55 = vpop.f32.mrf.mxu0 }
 0x26b   :  { %v1039_v56 = vpop.f32.mrf.mxu1 }
 0x26c   :  { %1074 = vst [vmem:[#allocation11 + $0x8] sm:$0xff] %v1070_v53  ;;  %v1071_v57 = vadd.f32 %v1062_v40, %v1038_v54  ;;  %v1040_v58 = vadd.f32 %v1039_v56, %v962_v55 }
 0x26e   :  { %1075 = vst [vmem:[#allocation11 + $0x10] sm:$0xff] %v1071_v57  ;;  %v1072_v59 = vadd.f32 %v1066_v48, %v1040_v58 }
 0x270   :  { %1076 = vst [vmem:[#allocation11 + $0x18] sm:$0xff] %v1072_v59 }
 0x271   :  { %1236 = shalt.err (!%p1233_p10)
}
 0x272   :  { %1088 = dma.vmem_to_hbm [thread:$0]  %s1083_s16, 512, %s1412_s5, [#allocation5], %s1257_s28, %s1257_s28, %s1258_s29  }
 0x273   :  { %1251 = dma.done.wait [#allocation5], 512  }
 0x274   :  { %1252 = vsyncadd [#allocation5], 4294966784 }
 0x275   :  { %1092 = vsyncpa [#allocation4], 1 }
 0x276   :  { %1093 = vsyncpa [#allocation7], 1 }
 0x277   :  { %1094 = vsyncpa [#allocation10], 1 }
 0x278   :  { %1095 = vsyncpa [#allocation5], 1 }

</bundles_post_ra>
